<compile_context>
chip_gen: v7x
topology: tpu7x:2x2x1
jax: 0.10.0
libtpu: 0.0.40
codegen_flags: <defaults>
</compile_context>

<pallas_src>
import jax
import jax.numpy as jnp
from jax.experimental import pallas as pl
from jax.experimental.pallas import tpu as pltpu


F_IN = 1000
F_IN_PAD = 1024      # 1000 -> multiple of 128 (lane-dense K for fc1)
H1 = 512
H2 = 256
F_OUT = 19
F_OUT_PAD = 128      # 19 -> one full lane group (lane-dense output store)


def _head_kernel(x_ref, w1_ref, b1_ref, w2_ref, b2_ref, w3_ref, b3_ref, o_ref):
    # x = F.relu(self.model(x))   -- ReLU in f32, then one cast to bf16 for MXU.
    x = jnp.maximum(x_ref[...], 0.0).astype(jnp.bfloat16)

    # x = F.relu(self.fc1(self.dropout1(x)))   (dropout1: eval-mode identity)
    h1 = jnp.dot(x, w1_ref[...], preferred_element_type=jnp.float32) + b1_ref[...]
    h1 = jnp.maximum(h1, 0.0).astype(jnp.bfloat16)

    # x = F.relu(self.fc2(self.dropout2(x)))   (dropout2: eval-mode identity)
    h2 = jnp.dot(h1, w2_ref[...], preferred_element_type=jnp.float32) + b2_ref[...]
    h2 = jnp.maximum(h2, 0.0).astype(jnp.bfloat16)

    # x = self.fc3(x)   (output dim padded to 128 lanes; sliced in the wrapper)
    out = jnp.dot(h2, w3_ref[...], preferred_element_type=jnp.float32) + b3_ref[...]
    o_ref[...] = out.astype(o_ref.dtype)


def convnet_head(x, w1, b1, w2, b2, w3, b3):
    """Fused MLP head.

    x : [B, 1000] f32 backbone logits
    w1: [1000, 512], w2: [512, 256], w3: [256, 19]   (any float dtype)
    b*: [1, fan_out] f32
    returns [B, 19] f32.
    """
    B = x.shape[0]

    # Pad batch rows to a sublane multiple (8).
    B_pad = ((B + 7) // 8) * 8
    if B_pad != B:
        x = jnp.pad(x, ((0, B_pad - B), (0, 0)))

    # Lane-dense padding: feature dim 1000 -> 1024, output dim 19 -> 128.
    x_p = jnp.pad(x, ((0, 0), (0, F_IN_PAD - F_IN)))
    w1_p = jnp.pad(w1, ((0, F_IN_PAD - F_IN), (0, 0))).astype(jnp.bfloat16)
    w2_b = w2.astype(jnp.bfloat16)
    w3_p = jnp.pad(w3, ((0, 0), (0, F_OUT_PAD - F_OUT))).astype(jnp.bfloat16)
    b1_f = b1.astype(jnp.float32)
    b2_f = b2.astype(jnp.float32)
    b3_p = jnp.pad(b3.astype(jnp.float32), ((0, 0), (0, F_OUT_PAD - F_OUT)))

    vmem = pl.BlockSpec(memory_space=pltpu.MemorySpace.VMEM)
    out_p = pl.pallas_call(
        _head_kernel,
        out_shape=jax.ShapeDtypeStruct((B_pad, F_OUT_PAD), jnp.float32),
        in_specs=[vmem] * 7,
        out_specs=vmem,
    )(x_p, w1_p, b1_f, w2_b, b2_f, w3_p, b3_p)

    return out_p[:B, :F_OUT]


def init_params(key):
    """Deterministic PyTorch-Linear-style init: U(-1/sqrt(fan_in), 1/sqrt(fan_in))."""
    dims = [(F_IN, H1), (H1, H2), (H2, F_OUT)]
    params = []
    for (fan_in, fan_out) in dims:
        key, kw, kb = jax.random.split(key, 3)
        bound = 1.0 / (fan_in ** 0.5)
        w = jax.random.uniform(kw, (fan_in, fan_out), jnp.float32, -bound, bound)
        b = jax.random.uniform(kb, (1, fan_out), jnp.float32, -bound, bound)
        params += [w, b]
    return params


if __name__ == "__main__":
    key = jax.random.PRNGKey(0)
    key, kx = jax.random.split(key)

    B = 8
    # Backbone output features (densenet121 classifier logits), shape [B, 1000].
    x = jax.random.normal(kx, (B, F_IN), jnp.float32)

    w1, b1, w2, b2, w3, b3 = init_params(key)

    out = convnet_head(x, w1, b1, w2, b2, w3, b3)
    out = jax.block_until_ready(out)
    assert out.shape == (B, F_OUT)

    # Reference 1: same bf16-weight / f32-accumulate recipe in pure JAX.
    h = jnp.maximum(x, 0.0).astype(jnp.bfloat16)
    h = jnp.maximum(
        jnp.dot(h, w1.astype(jnp.bfloat16), preferred_element_type=jnp.float32) + b1,
        0.0).astype(jnp.bfloat16)
    h = jnp.maximum(
        jnp.dot(h, w2.astype(jnp.bfloat16), preferred_element_type=jnp.float32) + b2,
        0.0).astype(jnp.bfloat16)
    ref_bf16 = jnp.dot(h, w3.astype(jnp.bfloat16),
                       preferred_element_type=jnp.float32) + b3
    assert jnp.allclose(out, ref_bf16, atol=1e-2, rtol=1e-2)

    # Reference 2: full-f32 module semantics (loose tolerance for bf16 weights).
    hf = jnp.maximum(x, 0.0)
    hf = jnp.maximum(hf @ w1 + b1, 0.0)
    hf = jnp.maximum(hf @ w2 + b2, 0.0)
    ref_f32 = hf @ w3 + b3
    assert jnp.allclose(out, ref_f32, atol=1e-1, rtol=1e-1)

    print("KERNEL_OK")
</pallas_src>

<mosaic_0001>
module attributes {stable_mosaic.version = 11 : i64} {
  func.func @_head_kernel(%arg0: memref<8x1024xf32, #tpu.memory_space<vmem>>, %arg1: memref<1024x512xbf16, #tpu.memory_space<vmem>>, %arg2: memref<1x512xf32, #tpu.memory_space<vmem>>, %arg3: memref<512x256xbf16, #tpu.memory_space<vmem>>, %arg4: memref<1x256xf32, #tpu.memory_space<vmem>>, %arg5: memref<256x128xbf16, #tpu.memory_space<vmem>>, %arg6: memref<1x128xf32, #tpu.memory_space<vmem>>, %arg7: memref<8x128xf32, #tpu.memory_space<vmem>>) attributes {dimension_semantics = [], scalar_prefetch = 0 : i64, scratch_operands = 0 : i64, tpu.core_type = #tpu.core_type<tc>} {
    %c0 = arith.constant 0 : index
    %c0_0 = arith.constant 0 : index
    %0 = vector.load %arg0[%c0, %c0_0] : memref<8x1024xf32, #tpu.memory_space<vmem>>, vector<8x1024xf32>
    %cst = arith.constant 0.000000e+00 : f32
    %1 = vector.broadcast %cst : f32 to vector<8x1024xf32>
    %2 = arith.maximumf %0, %1 : vector<8x1024xf32>
    %3 = arith.truncf %2 : vector<8x1024xf32> to vector<8x1024xbf16>
    %c0_1 = arith.constant 0 : index
    %c0_2 = arith.constant 0 : index
    %4 = vector.load %arg1[%c0_1, %c0_2] : memref<1024x512xbf16, #tpu.memory_space<vmem>>, vector<1024x512xbf16>
    %cst_3 = arith.constant dense<0.000000e+00> : vector<8x512xf32>
    %5 = tpu.matmul %3, %4, %cst_3 {dimension_numbers = #tpu.dot_dimension_numbers<[1], [0], [0], [1], [0, 0, 1, 1], [], []>} : vector<8x1024xbf16>, vector<1024x512xbf16>, vector<8x512xf32> -> vector<8x512xf32>
    %c0_4 = arith.constant 0 : index
    %c0_5 = arith.constant 0 : index
    %6 = vector.load %arg2[%c0_4, %c0_5] : memref<1x512xf32, #tpu.memory_space<vmem>>, vector<1x512xf32>
    %7 = vector.broadcast %6 : vector<1x512xf32> to vector<8x512xf32>
    %8 = arith.addf %5, %7 : vector<8x512xf32>
    %cst_6 = arith.constant 0.000000e+00 : f32
    %9 = vector.broadcast %cst_6 : f32 to vector<8x512xf32>
    %10 = arith.maximumf %8, %9 : vector<8x512xf32>
    %11 = arith.truncf %10 : vector<8x512xf32> to vector<8x512xbf16>
    %c0_7 = arith.constant 0 : index
    %c0_8 = arith.constant 0 : index
    %12 = vector.load %arg3[%c0_7, %c0_8] : memref<512x256xbf16, #tpu.memory_space<vmem>>, vector<512x256xbf16>
    %cst_9 = arith.constant dense<0.000000e+00> : vector<8x256xf32>
    %13 = tpu.matmul %11, %12, %cst_9 {dimension_numbers = #tpu.dot_dimension_numbers<[1], [0], [0], [1], [0, 0, 1, 1], [], []>} : vector<8x512xbf16>, vector<512x256xbf16>, vector<8x256xf32> -> vector<8x256xf32>
    %c0_10 = arith.constant 0 : index
    %c0_11 = arith.constant 0 : index
    %14 = vector.load %arg4[%c0_10, %c0_11] : memref<1x256xf32, #tpu.memory_space<vmem>>, vector<1x256xf32>
    %15 = vector.broadcast %14 : vector<1x256xf32> to vector<8x256xf32>
    %16 = arith.addf %13, %15 : vector<8x256xf32>
    %cst_12 = arith.constant 0.000000e+00 : f32
    %17 = vector.broadcast %cst_12 : f32 to vector<8x256xf32>
    %18 = arith.maximumf %16, %17 : vector<8x256xf32>
    %19 = arith.truncf %18 : vector<8x256xf32> to vector<8x256xbf16>
    %c0_13 = arith.constant 0 : index
    %c0_14 = arith.constant 0 : index
    %20 = vector.load %arg5[%c0_13, %c0_14] : memref<256x128xbf16, #tpu.memory_space<vmem>>, vector<256x128xbf16>
    %cst_15 = arith.constant dense<0.000000e+00> : vector<8x128xf32>
    %21 = tpu.matmul %19, %20, %cst_15 {dimension_numbers = #tpu.dot_dimension_numbers<[1], [0], [0], [1], [0, 0, 1, 1], [], []>} : vector<8x256xbf16>, vector<256x128xbf16>, vector<8x128xf32> -> vector<8x128xf32>
    %c0_16 = arith.constant 0 : index
    %c0_17 = arith.constant 0 : index
    %22 = vector.load %arg6[%c0_16, %c0_17] : memref<1x128xf32, #tpu.memory_space<vmem>>, vector<1x128xf32>
    %23 = vector.broadcast %22 : vector<1x128xf32> to vector<8x128xf32>
    %24 = arith.addf %21, %23 : vector<8x128xf32>
    %c0_18 = arith.constant 0 : index
    %c0_19 = arith.constant 0 : index
    %25 = vector.load %arg7[%c0_18, %c0_19] : memref<8x128xf32, #tpu.memory_space<vmem>>, vector<8x128xf32>
    tpu.vector_store %arg7[%c0_18, %c0_19], %24 {strides = array<i32>} : memref<8x128xf32, #tpu.memory_space<vmem>>, vector<8x128xf32>,
    return
  }
}

</mosaic_0001>

<bundles_post_ra>
// kernel: tpu_custom_call.1
= control target key start
LH: loop header
LB: loop body
LE: loop exit
PB: predicated region body
PF: predicated region fallthrough
CT: control target
= control target key end

     0   :  { %12 = vsyncpa [#allocation3], 0  ;;  %s3858_s0 = inlined_call_operand.hbm [shape: f32[8,1024], index: 0, kind: input, shape index: {}]   ;;  %s3859_s1 = inlined_call_operand.hbm [shape: bf16[1024,512], index: 1, kind: input, shape index: {}]   ;;  %s3860_s2 = inlined_call_operand.vmem [shape: f32[1,512], index: 2, kind: input, shape index: {}]   ;;  %s3861_s3 = inlined_call_operand.hbm [shape: bf16[512,256], index: 3, kind: input, shape index: {}]   ;;  %s3862_s4 = inlined_call_operand.vmem [shape: f32[1,256], index: 4, kind: input, shape index: {}]   ;;  %s3863_s5 = inlined_call_operand.hbm [shape: bf16[256,128], index: 5, kind: input, shape index: {}]   ;;  %s3864_s6 = inlined_call_operand.vmem [shape: f32[1,128], index: 6, kind: input, shape index: {}]   ;;  %s3865_s7 = inlined_call_operand.hbm [shape: f32[8,128], index: 7, kind: output, shape index: {}]  }
   0x1   :  { %13 = vsyncpa [#allocation6], 0 }
   0x2   :  { %14 = vsyncpa [#allocation9], 0 }
   0x3   :  { %15 = vsyncpa [#allocation4], 0  ;;  %s3690_s24 = smov [#allocation5]   ;;  %s3572_s28 = scalar_lea.hbm %s3859_s1, 32768 }
   0x4   :  { %s31_s25 = sshll.u32 %s3690_s24, 4  ;;  %p3573_p0 = scmp.ne.s32.totalorder %s3859_s1, %s3572_s28  ;;  %s32_s25 = int_to_ptr.vmem [resolvable:$true] %s31_s25 }
   0x5   :  { %p3576_p1 = scmp.lt.u32.totalorder %s3572_s28, %s3859_s1 }
   0x7   :  { %p3578_p2 = pnand %p3576_p1, %p3573_p0 }
   0x9   :  { %3581 = shalt.err (!%p3578_p2)
}
   0xa   :  { %s3582_s10 = scalar_lea.vmem %s32_s25, 32768  ;;  %p3587_p4 = scmp.lt.s32.totalorder %s32_s25, %s32_s25 }
   0xb   :  { %p3583_p3 = scmp.ne.s32.totalorder %s32_s25, %s3582_s10  ;;  %p3588_p5 = scmp.lt.s32.totalorder %s3582_s10, %s3582_s10 }
   0xd   :  { %p3589_p6 = por %p3588_p5, %p3587_p4 }
   0xf   :  { %p3590_p7 = pnand %p3589_p6, %p3583_p3 }
  0x11   :  { %3593 = shalt.err (!%p3590_p7)
}
  0x12   :  { %s3691_s11 = smov 256   ;;  %s3692_s12 = smov 16  }
  0x13   :  { %37 = dma.hbm_to_vmem [thread:$0]  %s3859_s1, 32768, %s32_s25, [#allocation6], %s3691_s11, %s3691_s11, %s3692_s12  }
  0x14   :  { %s3693_s15 = smov [#allocation2]   ;;  %s3694_s17 = smov [#allocation7]  }
  0x15   :  { %s22_s16 = sshll.u32 %s3693_s15, 4  ;;  %s45_s18 = sshll.u32 %s3694_s17, 4  ;;  %s23_s16 = int_to_ptr.vmem [resolvable:$true] %s22_s16  ;;  %s46_s18 = int_to_ptr.vmem [resolvable:$true] %s45_s18 }
  0x16   :  { %s3594_s21 = scalar_lea.hbm %s3858_s0, 1024 }
  0x17   :  { %p3595_p8 = scmp.ne.s32.totalorder %s3858_s0, %s3594_s21  ;;  %p3598_p9 = scmp.lt.u32.totalorder %s3594_s21, %s3858_s0 }
  0x19   :  { %p3600_p10 = pnand %p3598_p9, %p3595_p8 }
  0x1b   :  { %3603 = shalt.err (!%p3600_p10)
}
  0x1c   :  { %s3604_s1 = scalar_lea.vmem %s23_s16, 1024  ;;  %p3609_p12 = scmp.lt.s32.totalorder %s23_s16, %s23_s16 }
  0x1d   :  { %p3605_p11 = scmp.ne.s32.totalorder %s23_s16, %s3604_s1  ;;  %p3610_p13 = scmp.lt.s32.totalorder %s3604_s1, %s3604_s1 }
  0x1f   :  { %p3611_p0 = por %p3610_p13, %p3609_p12 }
  0x21   :  { %p3612_p1 = pnand %p3611_p0, %p3605_p11 }
  0x23   :  { %3615 = shalt.err (!%p3612_p1)
}
  0x24   :  { %25 = dma.hbm_to_vmem [thread:$0]  %s3858_s0, 1024, %s23_s16, [#allocation3]  }
  0x25   :  { %s3616_s30 = scalar_lea.hbm %s3861_s3, 8192 }
  0x26   :  { %p3617_p2 = scmp.ne.s32.totalorder %s3861_s3, %s3616_s30  ;;  %p3620_p3 = scmp.lt.u32.totalorder %s3616_s30, %s3861_s3 }
  0x28   :  { %p3622_p4 = pnand %p3620_p3, %p3617_p2 }
  0x2a   :  { %3625 = shalt.err (!%p3622_p4)
}
  0x2b   :  { %s3626_s12 = scalar_lea.vmem %s46_s18, 8192  ;;  %p3631_p6 = scmp.lt.s32.totalorder %s46_s18, %s46_s18 }
  0x2c   :  { %p3627_p5 = scmp.ne.s32.totalorder %s46_s18, %s3626_s12  ;;  %p3632_p7 = scmp.lt.s32.totalorder %s3626_s12, %s3626_s12 }
  0x2e   :  { %p3633_p8 = por %p3632_p7, %p3631_p6 }
  0x30   :  { %p3634_p9 = pnand %p3633_p8, %p3627_p5 }
  0x32   :  { %3637 = shalt.err (!%p3634_p9)
}
  0x33   :  { %s3695_s0 = smov 128   ;;  %s3696_s13 = smov 8  }
  0x34   :  { %51 = dma.hbm_to_vmem [thread:$0]  %s3861_s3, 8192, %s46_s18, [#allocation6], %s3695_s0, %s3695_s0, %s3696_s13  }
  0x35   :  { %s3697_s16 = smov [#allocation8]   ;;  %s3638_s21 = scalar_lea.hbm %s3863_s5, 2048 }
  0x36   :  { %s59_s17 = sshll.u32 %s3697_s16, 4  ;;  %p3639_p10 = scmp.ne.s32.totalorder %s3863_s5, %s3638_s21  ;;  %s60_s17 = int_to_ptr.vmem [resolvable:$true] %s59_s17 }
  0x37   :  { %p3642_p11 = scmp.lt.u32.totalorder %s3638_s21, %s3863_s5 }
  0x39   :  { %p3644_p12 = pnand %p3642_p11, %p3639_p10 }
  0x3b   :  { %3647 = shalt.err (!%p3644_p12)
}
  0x3c   :  { %s3648_s1 = scalar_lea.vmem %s60_s17, 2048  ;;  %p3653_p0 = scmp.lt.s32.totalorder %s60_s17, %s60_s17 }
  0x3d   :  { %p3649_p13 = scmp.ne.s32.totalorder %s60_s17, %s3648_s1  ;;  %p3654_p1 = scmp.lt.s32.totalorder %s3648_s1, %s3648_s1 }
  0x3f   :  { %p3655_p2 = por %p3654_p1, %p3653_p0 }
  0x41   :  { %p3656_p3 = pnand %p3655_p2, %p3649_p13 }
  0x43   :  { %3659 = shalt.err (!%p3656_p3)
}
  0x44   :  { %s3698_s3 = smov 64   ;;  %s3699_s18 = smov 4  }
  0x45   :  { %65 = dma.hbm_to_vmem [thread:$0]  %s3863_s5, 2048, %s60_s17, [#allocation9], %s3698_s3, %s3698_s3, %s3699_s18  }
  0x46   :  { %3682 = dma.done.wait [#allocation3], 1024  }
  0x47   :  { %3683 = vsyncadd [#allocation3], 4294966272 }
  0x48   :  { %3684 = dma.done.wait [#allocation6], 40960  }
  0x49   :  { %3685 = vsyncadd [#allocation6], 4294926336 }
  0x4a   :  { %3686 = dma.done.wait [#allocation9], 2048  }
  0x4b   :  { %3687 = vsyncadd [#allocation9], 4294965248  ;;  %v3076_v0 = vld [vmem:[#allocation5 + $0x4] ss:$16 sps:$4 sm:$0xff]   ;;  %v3080_v2 = vld [vmem:[#allocation5] ss:$16 sps:$4 sm:$0xff]  }
  0x4c   :  { %v3078_v1 = vld [vmem:[#allocation5 + $0x204] ss:$16 sps:$4 sm:$0xff]   ;;  %1663 = vmatprep.subr.bf16.mxu1 %v3076_v0  ;;  %v3081_v3 = vld [vmem:[#allocation5 + $0x200] ss:$16 sps:$4 sm:$0xff]   ;;  %v82_v46 = vld [vmem:[#allocation2 + $0x8] sm:$0xff]  ;;  %s3700_s8 = smov [#allocation10]  }
  0x4d   :  { %1704 = vmatprep.subr.bf16.mxu0 %v3078_v1  ;;  %v3082_v4 = vld [vmem:[#allocation5 + $0x24] ss:$16 sps:$4 sm:$0xff]   ;;  %1664 = vmatpush1.bf16.msra.mxu1 %v3080_v2  ;;  %v3086_v6 = vld [vmem:[#allocation5 + $0x20] ss:$16 sps:$4 sm:$0xff]   ;;  %v90_v48 = vmax.f32 %v82_v46, 0.0  ;;  %v84_v49 = vld [vmem:[#allocation2 + $0x18] sm:$0xff] }
  0x4e   :  { %1705 = vmatpush1.bf16.msra.mxu0 %v3081_v3  ;;  %v3084_v5 = vld [vmem:[#allocation5 + $0x224] ss:$16 sps:$4 sm:$0xff]   ;;  %1665 = vmatprep.subr.bf16.mxu1 %v3082_v4  ;;  %v3087_v7 = vld [vmem:[#allocation5 + $0x220] ss:$16 sps:$4 sm:$0xff]   ;;  %v92_v51 = vmax.f32 %v84_v49, 0.0  ;;  %s2663_s9 = sshll.u32 %s3700_s8, 4  ;;  %s2664_s9 = int_to_ptr.vmem [resolvable:$true] %s2663_s9 }
  0x4f   :  { %1706 = vmatprep.subr.bf16.mxu0 %v3084_v5  ;;  %v3088_v8 = vld [vmem:[#allocation5 + $0x44] ss:$16 sps:$4 sm:$0xff]   ;;  %v3092_v10 = vld [vmem:[#allocation5 + $0x40] ss:$16 sps:$4 sm:$0xff]   ;;  %v98_v54 = vpack.c.bf16 %v90_v48, %v90_v48  ;;  %v3217_v46 = vld [vmem:[#allocation5 + $0xe8] ss:$16 sps:$4 sm:$0xff]   ;;  %p3665_p5 = scmp.lt.s32.totalorder %s2664_s9, %s2664_s9 }
  0x50   :  { %v3090_v9 = vld [vmem:[#allocation5 + $0x244] ss:$16 sps:$4 sm:$0xff]   ;;  %v3093_v11 = vld [vmem:[#allocation5 + $0x240] ss:$16 sps:$4 sm:$0xff]   ;;  %v3789_v55 = vpack.c.bf16 %v92_v51, %v92_v51  ;;  %v3225_v48 = vld [vmem:[#allocation5 + $0x10c] ss:$16 sps:$4 sm:$0xff]  }
  0x51   :  { %1666 = vmatpush1.bf16.msra.mxu1 %v3086_v6  ;;  %v3094_v12 = vld [vmem:[#allocation5 + $0x64] ss:$16 sps:$4 sm:$0xff]   ;;  %v3098_v14 = vld [vmem:[#allocation5 + $0x60] ss:$16 sps:$4 sm:$0xff]   ;;  %1695 = vmatprep.mubr.bf16.mxu1 %v98_v54  ;;  %s3660_s10 = scalar_lea.vmem %s2664_s9, 128 }
  0x52   :  { %1707 = vmatpush1.bf16.msra.mxu0 %v3087_v7  ;;  %1667 = vmatprep.subr.bf16.mxu1 %v3088_v8  ;;  %v3096_v13 = vld [vmem:[#allocation5 + $0x264] ss:$16 sps:$4 sm:$0xff]   ;;  %v3099_v15 = vld [vmem:[#allocation5 + $0x260] ss:$16 sps:$4 sm:$0xff]   ;;  %p3661_p4 = scmp.ne.s32.totalorder %s2664_s9, %s3660_s10  ;;  %p3666_p6 = scmp.lt.s32.totalorder %s3660_s10, %s3660_s10 }
  0x53   :  { %1708 = vmatprep.subr.bf16.mxu0 %v3090_v9  ;;  %v3100_v16 = vld [vmem:[#allocation5 + $0x84] ss:$16 sps:$4 sm:$0xff]   ;;  %v3104_v18 = vld [vmem:[#allocation5 + $0x80] ss:$16 sps:$4 sm:$0xff]   ;;  %1736 = vmatprep.mubr.bf16.mxu0 %v3789_v55 }
  0x54   :  { %v3102_v17 = vld [vmem:[#allocation5 + $0x284] ss:$16 sps:$4 sm:$0xff]   ;;  %v3105_v19 = vld [vmem:[#allocation5 + $0x280] ss:$16 sps:$4 sm:$0xff]   ;;  %p3667_p7 = por %p3666_p6, %p3665_p5 }
  0x55   :  { %1668 = vmatpush1.bf16.msra.mxu1 %v3092_v10  ;;  %v3106_v20 = vld [vmem:[#allocation5 + $0xa4] ss:$16 sps:$4 sm:$0xff]   ;;  %v3110_v22 = vld [vmem:[#allocation5 + $0xa0] ss:$16 sps:$4 sm:$0xff]  }
  0x56   :  { %1709 = vmatpush1.bf16.msra.mxu0 %v3093_v11  ;;  %1669 = vmatprep.subr.bf16.mxu1 %v3094_v12  ;;  %v3108_v21 = vld [vmem:[#allocation5 + $0x2a4] ss:$16 sps:$4 sm:$0xff]   ;;  %v3111_v23 = vld [vmem:[#allocation5 + $0x2a0] ss:$16 sps:$4 sm:$0xff]   ;;  %v3177_v11 = vld [vmem:[#allocation5 + $0xc] ss:$16 sps:$4 sm:$0xff]   ;;  %p3668_p8 = pnand %p3667_p7, %p3661_p4 }
  0x57   :  { %1710 = vmatprep.subr.bf16.mxu0 %v3096_v13  ;;  %v3112_v24 = vld [vmem:[#allocation5 + $0xc4] ss:$16 sps:$4 sm:$0xff]   ;;  %v3116_v26 = vld [vmem:[#allocation5 + $0xc0] ss:$16 sps:$4 sm:$0xff]  }
  0x58   :  { %v3114_v25 = vld [vmem:[#allocation5 + $0x2c4] ss:$16 sps:$4 sm:$0xff]   ;;  %v3117_v27 = vld [vmem:[#allocation5 + $0x2c0] ss:$16 sps:$4 sm:$0xff]  }
  0x59   :  { %1670 = vmatpush1.bf16.msra.mxu1 %v3098_v14  ;;  %v3118_v28 = vld [vmem:[#allocation5 + $0xe4] ss:$16 sps:$4 sm:$0xff]   ;;  %v3122_v30 = vld [vmem:[#allocation5 + $0xe0] ss:$16 sps:$4 sm:$0xff]   ;;  %v3175_v14 = vld [vmem:[#allocation5 + $0x8] ss:$16 sps:$4 sm:$0xff]  }
  0x5a   :  { %1711 = vmatpush1.bf16.msra.mxu0 %v3099_v15  ;;  %1671 = vmatprep.subr.bf16.mxu1 %v3100_v16  ;;  %v3120_v29 = vld [vmem:[#allocation5 + $0x2e4] ss:$16 sps:$4 sm:$0xff]   ;;  %v3123_v31 = vld [vmem:[#allocation5 + $0x2e0] ss:$16 sps:$4 sm:$0xff]  }
  0x5b   :  { %1712 = vmatprep.subr.bf16.mxu0 %v3102_v17  ;;  %v3124_v32 = vld [vmem:[#allocation5 + $0x104] ss:$16 sps:$4 sm:$0xff]   ;;  %v3128_v34 = vld [vmem:[#allocation5 + $0x100] ss:$16 sps:$4 sm:$0xff]   ;;  %v3183_v17 = vld [vmem:[#allocation5 + $0x2c] ss:$16 sps:$4 sm:$0xff]  }
  0x5c   :  { %v3126_v33 = vld [vmem:[#allocation5 + $0x304] ss:$16 sps:$4 sm:$0xff]   ;;  %v3129_v35 = vld [vmem:[#allocation5 + $0x300] ss:$16 sps:$4 sm:$0xff]  }
  0x5d   :  { %1672 = vmatpush1.bf16.msra.mxu1 %v3104_v18  ;;  %v3130_v36 = vld [vmem:[#allocation5 + $0x124] ss:$16 sps:$4 sm:$0xff]   ;;  %v3134_v38 = vld [vmem:[#allocation5 + $0x120] ss:$16 sps:$4 sm:$0xff]  }
  0x5e   :  { %1713 = vmatpush1.bf16.msra.mxu0 %v3105_v19  ;;  %1673 = vmatprep.subr.bf16.mxu1 %v3106_v20  ;;  %v3132_v37 = vld [vmem:[#allocation5 + $0x324] ss:$16 sps:$4 sm:$0xff]   ;;  %v3135_v39 = vld [vmem:[#allocation5 + $0x320] ss:$16 sps:$4 sm:$0xff]   ;;  %v3181_v19 = vld [vmem:[#allocation5 + $0x28] ss:$16 sps:$4 sm:$0xff]  }
  0x5f   :  { %1714 = vmatprep.subr.bf16.mxu0 %v3108_v21  ;;  %v3136_v40 = vld [vmem:[#allocation5 + $0x144] ss:$16 sps:$4 sm:$0xff]   ;;  %v3140_v42 = vld [vmem:[#allocation5 + $0x140] ss:$16 sps:$4 sm:$0xff]   ;;  %v3189_v21 = vld [vmem:[#allocation5 + $0x4c] ss:$16 sps:$4 sm:$0xff]  }
  0x60   :  { %v3138_v41 = vld [vmem:[#allocation5 + $0x344] ss:$16 sps:$4 sm:$0xff]   ;;  %v3141_v43 = vld [vmem:[#allocation5 + $0x340] ss:$16 sps:$4 sm:$0xff]  }
  0x61   :  { %1674 = vmatpush1.bf16.msra.mxu1 %v3110_v22  ;;  %v3142_v44 = vld [vmem:[#allocation5 + $0x164] ss:$16 sps:$4 sm:$0xff]   ;;  %v3146_v47 = vld [vmem:[#allocation5 + $0x160] ss:$16 sps:$4 sm:$0xff]  }
  0x62   :  { %1715 = vmatpush1.bf16.msra.mxu0 %v3111_v23  ;;  %1675 = vmatprep.subr.bf16.mxu1 %v3112_v24  ;;  %v3144_v45 = vld [vmem:[#allocation5 + $0x364] ss:$16 sps:$4 sm:$0xff]   ;;  %v3147_v50 = vld [vmem:[#allocation5 + $0x360] ss:$16 sps:$4 sm:$0xff]   ;;  %v3187_v23 = vld [vmem:[#allocation5 + $0x48] ss:$16 sps:$4 sm:$0xff]  }
  0x63   :  { %1716 = vmatprep.subr.bf16.mxu0 %v3114_v25  ;;  %v3148_v52 = vld [vmem:[#allocation5 + $0x184] ss:$16 sps:$4 sm:$0xff]   ;;  %v3152_v56 = vld [vmem:[#allocation5 + $0x180] ss:$16 sps:$4 sm:$0xff]   ;;  %v3195_v25 = vld [vmem:[#allocation5 + $0x6c] ss:$16 sps:$4 sm:$0xff]  }
  0x64   :  { %v3150_v53 = vld [vmem:[#allocation5 + $0x384] ss:$16 sps:$4 sm:$0xff]   ;;  %v3153_v57 = vld [vmem:[#allocation5 + $0x380] ss:$16 sps:$4 sm:$0xff]  }
  0x65   :  { %1676 = vmatpush1.bf16.msra.mxu1 %v3116_v26  ;;  %v3154_v58 = vld [vmem:[#allocation5 + $0x1a4] ss:$16 sps:$4 sm:$0xff]   ;;  %v3158_v60 = vld [vmem:[#allocation5 + $0x1a0] ss:$16 sps:$4 sm:$0xff]  }
  0x66   :  { %1717 = vmatpush1.bf16.msra.mxu0 %v3117_v27  ;;  %1677 = vmatprep.subr.bf16.mxu1 %v3118_v28  ;;  %v3156_v59 = vld [vmem:[#allocation5 + $0x3a4] ss:$16 sps:$4 sm:$0xff]   ;;  %v3159_v61 = vld [vmem:[#allocation5 + $0x3a0] ss:$16 sps:$4 sm:$0xff]   ;;  %v3193_v27 = vld [vmem:[#allocation5 + $0x68] ss:$16 sps:$4 sm:$0xff]  }
  0x67   :  { %1718 = vmatprep.subr.bf16.mxu0 %v3120_v29  ;;  %v3160_v62 = vld [vmem:[#allocation5 + $0x1c4] ss:$16 sps:$4 sm:$0xff]   ;;  %v3164_v0 = vld [vmem:[#allocation5 + $0x1c0] ss:$16 sps:$4 sm:$0xff]   ;;  %v3201_v29 = vld [vmem:[#allocation5 + $0x8c] ss:$16 sps:$4 sm:$0xff]  }
  0x68   :  { %v3162_v63 = vld [vmem:[#allocation5 + $0x3c4] ss:$16 sps:$4 sm:$0xff]   ;;  %v3165_v1 = vld [vmem:[#allocation5 + $0x3c0] ss:$16 sps:$4 sm:$0xff]  }
  0x69   :  { %1678 = vmatpush1.bf16.msra.mxu1 %v3122_v30  ;;  %v3166_v2 = vld [vmem:[#allocation5 + $0x1e4] ss:$16 sps:$4 sm:$0xff]   ;;  %v3170_v6 = vld [vmem:[#allocation5 + $0x1e0] ss:$16 sps:$4 sm:$0xff]  }
  0x6a   :  { %1719 = vmatpush1.bf16.msra.mxu0 %v3123_v31  ;;  %1679 = vmatprep.subr.bf16.mxu1 %v3124_v32  ;;  %v81_v3 = vld [vmem:[#allocation2] sm:$0xff]  ;;  %v83_v4 = vld [vmem:[#allocation2 + $0x10] sm:$0xff]  ;;  %v3199_v31 = vld [vmem:[#allocation5 + $0x88] ss:$16 sps:$4 sm:$0xff]  }
  0x6b   :  { %1720 = vmatprep.subr.bf16.mxu0 %v3126_v33  ;;  %v3168_v5 = vld [vmem:[#allocation5 + $0x3e4] ss:$16 sps:$4 sm:$0xff]   ;;  %v3171_v7 = vld [vmem:[#allocation5 + $0x3e0] ss:$16 sps:$4 sm:$0xff]   ;;  %v89_v8 = vmax.f32 %v81_v3, 0.0  ;;  %v91_v9 = vmax.f32 %v83_v4, 0.0 }
  0x6c   :  { %v3174_v10 = vld [vmem:[#allocation5 + $0x404] ss:$16 sps:$4 sm:$0xff]   ;;  %v3172_v13 = vld [vmem:[#allocation5 + $0x400] ss:$16 sps:$4 sm:$0xff]   ;;  %v3207_v33 = vld [vmem:[#allocation5 + $0xac] ss:$16 sps:$4 sm:$0xff]  }
  0x6d   :  { %1680 = vmatpush1.bf16.msra.mxu1 %v3128_v34  ;;  %v3792_v12 = vpack.c.bf16 %v89_v8, %v89_v8  ;;  %v3794_v15 = vpack.c.bf16 %v91_v9, %v91_v9  ;;  %v3180_v16 = vld [vmem:[#allocation5 + $0x424] ss:$16 sps:$4 sm:$0xff]   ;;  %v3178_v18 = vld [vmem:[#allocation5 + $0x420] ss:$16 sps:$4 sm:$0xff]   ;;  %v3247_v3 = vld [vmem:[#allocation5 + $0x188] ss:$16 sps:$4 sm:$0xff]  }
  0x6e   :  { %1721 = vmatpush1.bf16.msra.mxu0 %v3129_v35  ;;  %1681 = vmatprep.subr.bf16.mxu1 %v3130_v36  ;;  %v3186_v20 = vld [vmem:[#allocation5 + $0x444] ss:$16 sps:$4 sm:$0xff]   ;;  %v3184_v22 = vld [vmem:[#allocation5 + $0x440] ss:$16 sps:$4 sm:$0xff]   ;;  %v3205_v35 = vld [vmem:[#allocation5 + $0xa8] ss:$16 sps:$4 sm:$0xff]  }
  0x6f   :  { %1722 = vmatprep.subr.bf16.mxu0 %v3132_v37  ;;  %v3192_v24 = vld [vmem:[#allocation5 + $0x464] ss:$16 sps:$4 sm:$0xff]   ;;  %v3190_v26 = vld [vmem:[#allocation5 + $0x460] ss:$16 sps:$4 sm:$0xff]   ;;  %v3213_v37 = vld [vmem:[#allocation5 + $0xcc] ss:$16 sps:$4 sm:$0xff]  }
  0x70   :  { %v3198_v28 = vld [vmem:[#allocation5 + $0x484] ss:$16 sps:$4 sm:$0xff]   ;;  %v3196_v30 = vld [vmem:[#allocation5 + $0x480] ss:$16 sps:$4 sm:$0xff]   ;;  %v3261_v9 = vld [vmem:[#allocation5 + $0x1cc] ss:$16 sps:$4 sm:$0xff]  }
  0x71   :  { %1682 = vmatpush1.bf16.msra.mxu1 %v3134_v38  ;;  %v3204_v32 = vld [vmem:[#allocation5 + $0x4a4] ss:$16 sps:$4 sm:$0xff]   ;;  %v3202_v34 = vld [vmem:[#allocation5 + $0x4a0] ss:$16 sps:$4 sm:$0xff]   ;;  %v86_v38 = vld [vmem:[#allocation2 + $0x28] sm:$0xff] }
  0x72   :  { %1723 = vmatpush1.bf16.msra.mxu0 %v3135_v39  ;;  %1683 = vmatprep.subr.bf16.mxu1 %v3136_v40  ;;  %v3210_v36 = vld [vmem:[#allocation5 + $0x4c4] ss:$16 sps:$4 sm:$0xff]   ;;  %v3208_v39 = vld [vmem:[#allocation5 + $0x4c0] ss:$16 sps:$4 sm:$0xff]   ;;  %v94_v40 = vmax.f32 %v86_v38, 0.0 }
  0x73   :  { %1724 = vmatprep.subr.bf16.mxu0 %v3138_v41  ;;  %v3211_v41 = vld [vmem:[#allocation5 + $0xc8] ss:$16 sps:$4 sm:$0xff]   ;;  %v3220_v49 = vld [vmem:[#allocation5 + $0x500] ss:$16 sps:$4 sm:$0xff]   ;;  %v3228_v51 = vld [vmem:[#allocation5 + $0x524] ss:$16 sps:$4 sm:$0xff]  }
  0x74   :  { %v3252_v4 = vld [vmem:[#allocation5 + $0x5a4] ss:$16 sps:$4 sm:$0xff]   ;;  %v3289_v38 = vld [vmem:[#allocation5 + $0x268] ss:$16 sps:$4 sm:$0xff]  }
  0x75   :  { %1684 = vmatpush1.bf16.msra.mxu1 %v3140_v42  ;;  %v3216_v42 = vld [vmem:[#allocation5 + $0x4e4] ss:$16 sps:$4 sm:$0xff]  }
  0x76   :  { %1725 = vmatpush1.bf16.msra.mxu0 %v3141_v43  ;;  %1685 = vmatprep.subr.bf16.mxu1 %v3142_v44  ;;  %v3219_v43 = vld [vmem:[#allocation5 + $0xec] ss:$16 sps:$4 sm:$0xff]   ;;  %v3798_v44 = vpack.c.bf16 %v94_v40, %v94_v40  ;;  %v3258_v8 = vld [vmem:[#allocation5 + $0x5c4] ss:$16 sps:$4 sm:$0xff]  }
  0x77   :  { %1726 = vmatprep.subr.bf16.mxu0 %v3144_v45  ;;  %v3214_v45 = vld [vmem:[#allocation5 + $0x4e0] ss:$16 sps:$4 sm:$0xff]   ;;  %v3297_v40 = vld [vmem:[#allocation5 + $0x28c] ss:$16 sps:$4 sm:$0xff]  }
  0x79   :  { %1686 = vmatpush1.bf16.msra.mxu1 %v3146_v47  ;;  %v3222_v47 = vld [vmem:[#allocation5 + $0x504] ss:$16 sps:$4 sm:$0xff]  }
  0x7a   :  { %1727 = vmatpush1.bf16.msra.mxu0 %v3147_v50  ;;  %1687 = vmatprep.subr.bf16.mxu1 %v3148_v52  ;;  %v3223_v50 = vld [vmem:[#allocation5 + $0x108] ss:$16 sps:$4 sm:$0xff]   ;;  %v3231_v52 = vld [vmem:[#allocation5 + $0x12c] ss:$16 sps:$4 sm:$0xff]  }
  0x7b   :  { %1728 = vmatprep.subr.bf16.mxu0 %v3150_v53  ;;  %v3226_v53 = vld [vmem:[#allocation5 + $0x520] ss:$16 sps:$4 sm:$0xff]  }
  0x7d   :  { %1688 = vmatpush1.bf16.msra.mxu1 %v3152_v56  ;;  %v3234_v56 = vld [vmem:[#allocation5 + $0x544] ss:$16 sps:$4 sm:$0xff]  }
  0x7e   :  { %1729 = vmatpush1.bf16.msra.mxu0 %v3153_v57  ;;  %1689 = vmatprep.subr.bf16.mxu1 %v3154_v58  ;;  %v3237_v57 = vld [vmem:[#allocation5 + $0x14c] ss:$16 sps:$4 sm:$0xff]   ;;  %v3232_v58 = vld [vmem:[#allocation5 + $0x540] ss:$16 sps:$4 sm:$0xff]  }
  0x7f   :  { %1730 = vmatprep.subr.bf16.mxu0 %v3156_v59  ;;  %v3235_v59 = vld [vmem:[#allocation5 + $0x148] ss:$16 sps:$4 sm:$0xff]  }
  0x81   :  { %1690 = vmatpush1.bf16.msra.mxu1 %v3158_v60  ;;  %v3240_v60 = vld [vmem:[#allocation5 + $0x564] ss:$16 sps:$4 sm:$0xff]  }
  0x82   :  { %1731 = vmatpush1.bf16.msra.mxu0 %v3159_v61  ;;  %1691 = vmatprep.subr.bf16.mxu1 %v3160_v62  ;;  %v3243_v61 = vld [vmem:[#allocation5 + $0x16c] ss:$16 sps:$4 sm:$0xff]   ;;  %v3238_v62 = vld [vmem:[#allocation5 + $0x560] ss:$16 sps:$4 sm:$0xff]  }
  0x83   :  { %1732 = vmatprep.subr.bf16.mxu0 %v3162_v63  ;;  %v3241_v63 = vld [vmem:[#allocation5 + $0x168] ss:$16 sps:$4 sm:$0xff]  }
  0x85   :  { %1692 = vmatpush1.bf16.msra.mxu1 %v3164_v0  ;;  %v3246_v0 = vld [vmem:[#allocation5 + $0x584] ss:$16 sps:$4 sm:$0xff]  }
  0x86   :  { %1733 = vmatpush1.bf16.msra.mxu0 %v3165_v1  ;;  %1693 = vmatprep.subr.bf16.mxu1 %v3166_v2  ;;  %v3249_v1 = vld [vmem:[#allocation5 + $0x18c] ss:$16 sps:$4 sm:$0xff]   ;;  %v3244_v2 = vld [vmem:[#allocation5 + $0x580] ss:$16 sps:$4 sm:$0xff]  }
  0x87   :  { %1734 = vmatprep.subr.bf16.mxu0 %v3168_v5  ;;  %v3255_v5 = vld [vmem:[#allocation5 + $0x1ac] ss:$16 sps:$4 sm:$0xff]  }
  0x89   :  { %1694 = vmatpush1.bf16.msra.mxu1 %v3170_v6  ;;  %v3250_v6 = vld [vmem:[#allocation5 + $0x5a0] ss:$16 sps:$4 sm:$0xff]  }
  0x8a   :  { %1735 = vmatpush1.bf16.msra.mxu0 %v3171_v7  ;;  %1827 = vmatprep.subr.bf16.mxu1 %v3177_v11  ;;  %v3253_v7 = vld [vmem:[#allocation5 + $0x1a8] ss:$16 sps:$4 sm:$0xff]  }
  0x8b   :  { %1745 = vmatprep.subr.bf16.mxu0 %v3174_v10  ;;  %v3256_v10 = vld [vmem:[#allocation5 + $0x5c0] ss:$16 sps:$4 sm:$0xff]   ;;  %v3259_v11 = vld [vmem:[#allocation5 + $0x1c8] ss:$16 sps:$4 sm:$0xff]  }
  0x8c   :  { %1696 = vmatmul.mubr.bf16.vlgmr.msra.gmra.mrb[0].mxu1 %v3792_v12 }
  0x8d   :  { %1737 = vmatmul.mubr.bf16.vlgmr.msra.gmra.mrb[0].mxu0 %v3794_v15  ;;  %1828 = vmatpush1.bf16.msra.mxu1 %v3175_v14  ;;  %v3264_v14 = vld [vmem:[#allocation5 + $0x5e4] ss:$16 sps:$4 sm:$0xff]  }
  0x8e   :  { %1746 = vmatpush1.bf16.msra.mxu0 %v3172_v13  ;;  %1829 = vmatprep.subr.bf16.mxu1 %v3183_v17  ;;  %v85_v13 = vld [vmem:[#allocation2 + $0x20] sm:$0xff] }
  0x8f   :  { %1747 = vmatprep.subr.bf16.mxu0 %v3180_v16  ;;  %1859 = vmatprep.mubr.bf16.mxu1 %v98_v54  ;;  %v3229_v54 = vld [vmem:[#allocation5 + $0x128] ss:$16 sps:$4 sm:$0xff]   ;;  %v3267_v16 = vld [vmem:[#allocation5 + $0x1ec] ss:$16 sps:$4 sm:$0xff]   ;;  %v93_v17 = vmax.f32 %v85_v13, 0.0 }
  0x90   :  { %1777 = vmatprep.mubr.bf16.mxu0 %v3798_v44  ;;  %v3348_v13 = vld [vmem:[#allocation5 + $0x7a4] ss:$16 sps:$4 sm:$0xff]  }
  0x91   :  { %1830 = vmatpush1.bf16.msra.mxu1 %v3181_v19  ;;  %v3265_v19 = vld [vmem:[#allocation5 + $0x1e8] ss:$16 sps:$4 sm:$0xff]  }
  0x92   :  { %1748 = vmatpush1.bf16.msra.mxu0 %v3178_v18  ;;  %1831 = vmatprep.subr.bf16.mxu1 %v3189_v21  ;;  %v3262_v18 = vld [vmem:[#allocation5 + $0x5e0] ss:$16 sps:$4 sm:$0xff]   ;;  %v3273_v21 = vld [vmem:[#allocation5 + $0x20c] ss:$16 sps:$4 sm:$0xff]  }
  0x93   :  { %1749 = vmatprep.subr.bf16.mxu0 %v3186_v20  ;;  %v3270_v20 = vld [vmem:[#allocation5 + $0x604] ss:$16 sps:$4 sm:$0xff]  }
  0x95   :  { %1832 = vmatpush1.bf16.msra.mxu1 %v3187_v23  ;;  %v3268_v23 = vld [vmem:[#allocation5 + $0x600] ss:$16 sps:$4 sm:$0xff]  }
  0x96   :  { %1750 = vmatpush1.bf16.msra.mxu0 %v3184_v22  ;;  %1833 = vmatprep.subr.bf16.mxu1 %v3195_v25  ;;  %v3801_v22 = vpack.c.bf16 %v93_v17, %v93_v17  ;;  %v3276_v25 = vld [vmem:[#allocation5 + $0x624] ss:$16 sps:$4 sm:$0xff]   ;;  %v3349_v17 = vld [vmem:[#allocation5 + $0x3a8] ss:$16 sps:$4 sm:$0xff]  }
  0x97   :  { %1751 = vmatprep.subr.bf16.mxu0 %v3192_v24  ;;  %v3271_v24 = vld [vmem:[#allocation5 + $0x208] ss:$16 sps:$4 sm:$0xff]  }
  0x99   :  { %1834 = vmatpush1.bf16.msra.mxu1 %v3193_v27  ;;  %v88_v27 = vld [vmem:[#allocation2 + $0x38] sm:$0xff] }
  0x9a   :  { %1752 = vmatpush1.bf16.msra.mxu0 %v3190_v26  ;;  %1835 = vmatprep.subr.bf16.mxu1 %v3201_v29  ;;  %v3279_v26 = vld [vmem:[#allocation5 + $0x22c] ss:$16 sps:$4 sm:$0xff]   ;;  %v96_v29 = vmax.f32 %v88_v27, 0.0 }
  0x9b   :  { %1753 = vmatprep.subr.bf16.mxu0 %v3198_v28  ;;  %v3274_v28 = vld [vmem:[#allocation5 + $0x620] ss:$16 sps:$4 sm:$0xff]  }
  0x9d   :  { %1836 = vmatpush1.bf16.msra.mxu1 %v3199_v31  ;;  %v3282_v31 = vld [vmem:[#allocation5 + $0x644] ss:$16 sps:$4 sm:$0xff]  }
  0x9e   :  { %1754 = vmatpush1.bf16.msra.mxu0 %v3196_v30  ;;  %1837 = vmatprep.subr.bf16.mxu1 %v3207_v33  ;;  %v3277_v30 = vld [vmem:[#allocation5 + $0x228] ss:$16 sps:$4 sm:$0xff]   ;;  %v3805_v33 = vpack.c.bf16 %v96_v29, %v96_v29  ;;  %v3366_v29 = vld [vmem:[#allocation5 + $0x40c] ss:$16 sps:$4 sm:$0xff]  }
  0x9f   :  { %1755 = vmatprep.subr.bf16.mxu0 %v3204_v32  ;;  %v3285_v32 = vld [vmem:[#allocation5 + $0x24c] ss:$16 sps:$4 sm:$0xff]  }
  0xa1   :  { %1838 = vmatpush1.bf16.msra.mxu1 %v3205_v35  ;;  %v3283_v35 = vld [vmem:[#allocation5 + $0x248] ss:$16 sps:$4 sm:$0xff]  }
  0xa2   :  { %1756 = vmatpush1.bf16.msra.mxu0 %v3202_v34  ;;  %1839 = vmatprep.subr.bf16.mxu1 %v3213_v37  ;;  %v3280_v34 = vld [vmem:[#allocation5 + $0x640] ss:$16 sps:$4 sm:$0xff]  }
  0xa3   :  { %1757 = vmatprep.subr.bf16.mxu0 %v3210_v36  ;;  %v3291_v36 = vld [vmem:[#allocation5 + $0x26c] ss:$16 sps:$4 sm:$0xff]   ;;  %v3286_v37 = vld [vmem:[#allocation5 + $0x660] ss:$16 sps:$4 sm:$0xff]  }
  0xa5   :  { %1840 = vmatpush1.bf16.msra.mxu1 %v3211_v41  ;;  %v3292_v41 = vld [vmem:[#allocation5 + $0x680] ss:$16 sps:$4 sm:$0xff]  }
  0xa6   :  { %1758 = vmatpush1.bf16.msra.mxu0 %v3208_v39  ;;  %1841 = vmatprep.subr.bf16.mxu1 %v3219_v43  ;;  %v3294_v39 = vld [vmem:[#allocation5 + $0x684] ss:$16 sps:$4 sm:$0xff]   ;;  %v3303_v43 = vld [vmem:[#allocation5 + $0x2ac] ss:$16 sps:$4 sm:$0xff]  }
  0xa7   :  { %1759 = vmatprep.subr.bf16.mxu0 %v3216_v42  ;;  %v3300_v42 = vld [vmem:[#allocation5 + $0x6a4] ss:$16 sps:$4 sm:$0xff]  }
  0xa9   :  { %1842 = vmatpush1.bf16.msra.mxu1 %v3217_v46  ;;  %v3301_v46 = vld [vmem:[#allocation5 + $0x2a8] ss:$16 sps:$4 sm:$0xff]  }
  0xaa   :  { %1760 = vmatpush1.bf16.msra.mxu0 %v3214_v45  ;;  %1843 = vmatprep.subr.bf16.mxu1 %v3225_v48  ;;  %v3298_v45 = vld [vmem:[#allocation5 + $0x6a0] ss:$16 sps:$4 sm:$0xff]   ;;  %v3309_v48 = vld [vmem:[#allocation5 + $0x2cc] ss:$16 sps:$4 sm:$0xff]  }
  0xab   :  { %1761 = vmatprep.subr.bf16.mxu0 %v3222_v47  ;;  %v3306_v47 = vld [vmem:[#allocation5 + $0x6c4] ss:$16 sps:$4 sm:$0xff]  }
  0xad   :  { %1844 = vmatpush1.bf16.msra.mxu1 %v3223_v50  ;;  %v3307_v50 = vld [vmem:[#allocation5 + $0x2c8] ss:$16 sps:$4 sm:$0xff]  }
  0xae   :  { %1762 = vmatpush1.bf16.msra.mxu0 %v3220_v49  ;;  %1845 = vmatprep.subr.bf16.mxu1 %v3231_v52  ;;  %v3304_v49 = vld [vmem:[#allocation5 + $0x6c0] ss:$16 sps:$4 sm:$0xff]   ;;  %v3315_v52 = vld [vmem:[#allocation5 + $0x2ec] ss:$16 sps:$4 sm:$0xff]  }
  0xaf   :  { %1763 = vmatprep.subr.bf16.mxu0 %v3228_v51  ;;  %v3312_v51 = vld [vmem:[#allocation5 + $0x6e4] ss:$16 sps:$4 sm:$0xff]  }
  0xb1   :  { %1846 = vmatpush1.bf16.msra.mxu1 %v3229_v54  ;;  %v3313_v54 = vld [vmem:[#allocation5 + $0x2e8] ss:$16 sps:$4 sm:$0xff]  }
  0xb2   :  { %1764 = vmatpush1.bf16.msra.mxu0 %v3226_v53  ;;  %1847 = vmatprep.subr.bf16.mxu1 %v3237_v57  ;;  %v3310_v53 = vld [vmem:[#allocation5 + $0x6e0] ss:$16 sps:$4 sm:$0xff]   ;;  %v3321_v57 = vld [vmem:[#allocation5 + $0x30c] ss:$16 sps:$4 sm:$0xff]  }
  0xb3   :  { %1765 = vmatprep.subr.bf16.mxu0 %v3234_v56  ;;  %v3318_v56 = vld [vmem:[#allocation5 + $0x704] ss:$16 sps:$4 sm:$0xff]  }
  0xb5   :  { %1848 = vmatpush1.bf16.msra.mxu1 %v3235_v59  ;;  %v3319_v59 = vld [vmem:[#allocation5 + $0x308] ss:$16 sps:$4 sm:$0xff]  }
  0xb6   :  { %1766 = vmatpush1.bf16.msra.mxu0 %v3232_v58  ;;  %1849 = vmatprep.subr.bf16.mxu1 %v3243_v61  ;;  %v3316_v58 = vld [vmem:[#allocation5 + $0x700] ss:$16 sps:$4 sm:$0xff]   ;;  %v3327_v61 = vld [vmem:[#allocation5 + $0x32c] ss:$16 sps:$4 sm:$0xff]  }
  0xb7   :  { %1767 = vmatprep.subr.bf16.mxu0 %v3240_v60  ;;  %v3324_v60 = vld [vmem:[#allocation5 + $0x724] ss:$16 sps:$4 sm:$0xff]  }
  0xb9   :  { %1850 = vmatpush1.bf16.msra.mxu1 %v3241_v63  ;;  %v3325_v63 = vld [vmem:[#allocation5 + $0x328] ss:$16 sps:$4 sm:$0xff]  }
  0xba   :  { %1768 = vmatpush1.bf16.msra.mxu0 %v3238_v62  ;;  %1851 = vmatprep.subr.bf16.mxu1 %v3249_v1  ;;  %v3322_v62 = vld [vmem:[#allocation5 + $0x720] ss:$16 sps:$4 sm:$0xff]   ;;  %v3333_v1 = vld [vmem:[#allocation5 + $0x34c] ss:$16 sps:$4 sm:$0xff]  }
  0xbb   :  { %1769 = vmatprep.subr.bf16.mxu0 %v3246_v0  ;;  %v3330_v0 = vld [vmem:[#allocation5 + $0x744] ss:$16 sps:$4 sm:$0xff]  }
  0xbd   :  { %1852 = vmatpush1.bf16.msra.mxu1 %v3247_v3  ;;  %v3331_v3 = vld [vmem:[#allocation5 + $0x348] ss:$16 sps:$4 sm:$0xff]  }
  0xbe   :  { %1770 = vmatpush1.bf16.msra.mxu0 %v3244_v2  ;;  %1853 = vmatprep.subr.bf16.mxu1 %v3255_v5  ;;  %v3328_v2 = vld [vmem:[#allocation5 + $0x740] ss:$16 sps:$4 sm:$0xff]   ;;  %v3339_v5 = vld [vmem:[#allocation5 + $0x36c] ss:$16 sps:$4 sm:$0xff]  }
  0xbf   :  { %1771 = vmatprep.subr.bf16.mxu0 %v3252_v4  ;;  %v3336_v4 = vld [vmem:[#allocation5 + $0x764] ss:$16 sps:$4 sm:$0xff]  }
  0xc1   :  { %1854 = vmatpush1.bf16.msra.mxu1 %v3253_v7  ;;  %v3337_v7 = vld [vmem:[#allocation5 + $0x368] ss:$16 sps:$4 sm:$0xff]  }
  0xc2   :  { %1772 = vmatpush1.bf16.msra.mxu0 %v3250_v6  ;;  %1855 = vmatprep.subr.bf16.mxu1 %v3261_v9  ;;  %v3334_v6 = vld [vmem:[#allocation5 + $0x760] ss:$16 sps:$4 sm:$0xff]   ;;  %v3345_v9 = vld [vmem:[#allocation5 + $0x38c] ss:$16 sps:$4 sm:$0xff]  }
  0xc3   :  { %1773 = vmatprep.subr.bf16.mxu0 %v3258_v8  ;;  %v3342_v8 = vld [vmem:[#allocation5 + $0x784] ss:$16 sps:$4 sm:$0xff]  }
  0xc5   :  { %1856 = vmatpush1.bf16.msra.mxu1 %v3259_v11  ;;  %v3343_v11 = vld [vmem:[#allocation5 + $0x388] ss:$16 sps:$4 sm:$0xff]  }
  0xc6   :  { %1774 = vmatpush1.bf16.msra.mxu0 %v3256_v10  ;;  %1857 = vmatprep.subr.bf16.mxu1 %v3267_v16  ;;  %v3340_v10 = vld [vmem:[#allocation5 + $0x780] ss:$16 sps:$4 sm:$0xff]  }
  0xc7   :  { %1775 = vmatprep.subr.bf16.mxu0 %v3264_v14  ;;  %v3351_v14 = vld [vmem:[#allocation5 + $0x3ac] ss:$16 sps:$4 sm:$0xff]   ;;  %v3346_v16 = vld [vmem:[#allocation5 + $0x7a0] ss:$16 sps:$4 sm:$0xff]  }
  0xc9   :  { %1858 = vmatpush1.bf16.msra.mxu1 %v3265_v19  ;;  %v3357_v19 = vld [vmem:[#allocation5 + $0x3cc] ss:$16 sps:$4 sm:$0xff]  }
  0xca   :  { %1776 = vmatpush1.bf16.msra.mxu0 %v3262_v18  ;;  %1868 = vmatprep.subr.bf16.mxu1 %v3273_v21  ;;  %v3354_v18 = vld [vmem:[#allocation5 + $0x7c4] ss:$16 sps:$4 sm:$0xff]   ;;  %v3355_v21 = vld [vmem:[#allocation5 + $0x3c8] ss:$16 sps:$4 sm:$0xff]  }
  0xcb   :  { %1786 = vmatprep.subr.bf16.mxu0 %v3270_v20  ;;  %v3352_v20 = vld [vmem:[#allocation5 + $0x7c0] ss:$16 sps:$4 sm:$0xff]  }
  0xcc   :  { %1860 = vmatmul.mubr.bf16.vlgmr.msra.gmra.mrb[4].mxu1 %v3792_v12  ;;  %v3288_v12 = vld [vmem:[#allocation5 + $0x664] ss:$16 sps:$4 sm:$0xff]  }
  0xcd   :  { %1778 = vmatmul.mubr.bf16.vlgmr.msra.gmra.mrb[0].mxu0 %v3801_v22  ;;  %1869 = vmatpush1.bf16.msra.mxu1 %v3271_v24  ;;  %v3363_v24 = vld [vmem:[#allocation5 + $0x3ec] ss:$16 sps:$4 sm:$0xff]  }
  0xce   :  { %1787 = vmatpush1.bf16.msra.mxu0 %v3268_v23  ;;  %1870 = vmatprep.subr.bf16.mxu1 %v3279_v26  ;;  %v3360_v23 = vld [vmem:[#allocation5 + $0x7e4] ss:$16 sps:$4 sm:$0xff]   ;;  %v3358_v26 = vld [vmem:[#allocation5 + $0x7e0] ss:$16 sps:$4 sm:$0xff]  }
  0xcf   :  { %1788 = vmatprep.subr.bf16.mxu0 %v3276_v25  ;;  %1900 = vmatprep.mubr.bf16.mxu1 %v3789_v55  ;;  %v3295_v55 = vld [vmem:[#allocation5 + $0x288] ss:$16 sps:$4 sm:$0xff]   ;;  %v87_v25 = vld [vmem:[#allocation2 + $0x30] sm:$0xff] }
  0xd0   :  { %1818 = vmatprep.mubr.bf16.mxu0 %v3805_v33  ;;  %v95_v27 = vmax.f32 %v87_v25, 0.0  ;;  %v3406_v25 = vld [vmem:[#allocation5 + $0x5c8] ss:$16 sps:$4 sm:$0xff]  }
  0xd1   :  { %1871 = vmatpush1.bf16.msra.mxu1 %v3277_v30  ;;  %v3364_v30 = vld [vmem:[#allocation5 + $0x408] ss:$16 sps:$4 sm:$0xff]  }
  0xd2   :  { %1789 = vmatpush1.bf16.msra.mxu0 %v3274_v28  ;;  %1872 = vmatprep.subr.bf16.mxu1 %v3285_v32  ;;  %v3361_v28 = vld [vmem:[#allocation5 + $0x3e8] ss:$16 sps:$4 sm:$0xff]   ;;  %v3369_v32 = vld [vmem:[#allocation5 + $0x42c] ss:$16 sps:$4 sm:$0xff]  }
  0xd3   :  { %1790 = vmatprep.subr.bf16.mxu0 %v3282_v31  ;;  %v3809_v31 = vpack.c.bf16 %v95_v27, %v95_v27  ;;  %v3409_v27 = vld [vmem:[#allocation5 + $0x5e8] ss:$16 sps:$4 sm:$0xff]  }
  0xd5   :  { %1873 = vmatpush1.bf16.msra.mxu1 %v3283_v35  ;;  %v3462_v35 = vld [vmem:[#allocation7 + $0x4] ss:$8 sps:$4 sm:$0xff]  }
  0xd6   :  { %1791 = vmatpush1.bf16.msra.mxu0 %v3280_v34  ;;  %1874 = vmatprep.subr.bf16.mxu1 %v3291_v36  ;;  %v3460_v34 = vld [vmem:[#allocation7] ss:$8 sps:$4 sm:$0xff]   ;;  %v3465_v36 = vld [vmem:[#allocation7 + $0x14] ss:$8 sps:$4 sm:$0xff]  }
  0xd7   :  { %1792 = vmatprep.subr.bf16.mxu0 %v3288_v12  ;;  %v3367_v12 = vld [vmem:[#allocation5 + $0x428] ss:$16 sps:$4 sm:$0xff]  }
  0xd9   :  { %1875 = vmatpush1.bf16.msra.mxu1 %v3289_v38  ;;  %v3463_v38 = vld [vmem:[#allocation7 + $0x10] ss:$8 sps:$4 sm:$0xff]  }
  0xda   :  { %1793 = vmatpush1.bf16.msra.mxu0 %v3286_v37  ;;  %1876 = vmatprep.subr.bf16.mxu1 %v3297_v40  ;;  %v3372_v37 = vld [vmem:[#allocation5 + $0x44c] ss:$16 sps:$4 sm:$0xff]   ;;  %v3370_v40 = vld [vmem:[#allocation5 + $0x448] ss:$16 sps:$4 sm:$0xff]  }
  0xdb   :  { %1794 = vmatprep.subr.bf16.mxu0 %v3294_v39  ;;  %v3468_v39 = vld [vmem:[#allocation7 + $0x24] ss:$8 sps:$4 sm:$0xff]  }
  0xdd   :  { %1877 = vmatpush1.bf16.msra.mxu1 %v3295_v55  ;;  %v3373_v55 = vld [vmem:[#allocation5 + $0x468] ss:$16 sps:$4 sm:$0xff]  }
  0xde   :  { %1795 = vmatpush1.bf16.msra.mxu0 %v3292_v41  ;;  %1878 = vmatprep.subr.bf16.mxu1 %v3303_v43  ;;  %v3375_v41 = vld [vmem:[#allocation5 + $0x46c] ss:$16 sps:$4 sm:$0xff]  }
  0xdf   :  { %1796 = vmatprep.subr.bf16.mxu0 %v3300_v42  ;;  %v3378_v42 = vld [vmem:[#allocation5 + $0x48c] ss:$16 sps:$4 sm:$0xff]  }
  0xe0   :  { %v3471_v43 = vld [vmem:[#allocation7 + $0x34] ss:$8 sps:$4 sm:$0xff]  }
  0xe1   :  { %1879 = vmatpush1.bf16.msra.mxu1 %v3301_v46  ;;  %v3376_v46 = vld [vmem:[#allocation5 + $0x488] ss:$16 sps:$4 sm:$0xff]  }
  0xe2   :  { %1797 = vmatpush1.bf16.msra.mxu0 %v3298_v45  ;;  %1880 = vmatprep.subr.bf16.mxu1 %v3309_v48  ;;  %v3474_v45 = vld [vmem:[#allocation7 + $0x44] ss:$8 sps:$4 sm:$0xff]   ;;  %v3472_v48 = vld [vmem:[#allocation7 + $0x40] ss:$8 sps:$4 sm:$0xff]  }
  0xe3   :  { %1798 = vmatprep.subr.bf16.mxu0 %v3306_v47  ;;  %v3381_v47 = vld [vmem:[#allocation5 + $0x4ac] ss:$16 sps:$4 sm:$0xff]  }
  0xe5   :  { %1881 = vmatpush1.bf16.msra.mxu1 %v3307_v50  ;;  %v3379_v50 = vld [vmem:[#allocation5 + $0x4a8] ss:$16 sps:$4 sm:$0xff]  }
  0xe6   :  { %1799 = vmatpush1.bf16.msra.mxu0 %v3304_v49  ;;  %1882 = vmatprep.subr.bf16.mxu1 %v3315_v52  ;;  %v3477_v49 = vld [vmem:[#allocation7 + $0x54] ss:$8 sps:$4 sm:$0xff]   ;;  %v3475_v52 = vld [vmem:[#allocation7 + $0x50] ss:$8 sps:$4 sm:$0xff]  }
  0xe7   :  { %1800 = vmatprep.subr.bf16.mxu0 %v3312_v51  ;;  %v3384_v51 = vld [vmem:[#allocation5 + $0x4cc] ss:$16 sps:$4 sm:$0xff]  }
  0xe9   :  { %1883 = vmatpush1.bf16.msra.mxu1 %v3313_v54  ;;  %v3382_v54 = vld [vmem:[#allocation5 + $0x4c8] ss:$16 sps:$4 sm:$0xff]  }
  0xea   :  { %1801 = vmatpush1.bf16.msra.mxu0 %v3310_v53  ;;  %1884 = vmatprep.subr.bf16.mxu1 %v3321_v57  ;;  %v3480_v53 = vld [vmem:[#allocation7 + $0x64] ss:$8 sps:$4 sm:$0xff]   ;;  %v3478_v57 = vld [vmem:[#allocation7 + $0x60] ss:$8 sps:$4 sm:$0xff]  }
  0xeb   :  { %1802 = vmatprep.subr.bf16.mxu0 %v3318_v56  ;;  %v3387_v56 = vld [vmem:[#allocation5 + $0x4ec] ss:$16 sps:$4 sm:$0xff]  }
  0xed   :  { %1885 = vmatpush1.bf16.msra.mxu1 %v3319_v59  ;;  %v3385_v59 = vld [vmem:[#allocation5 + $0x4e8] ss:$16 sps:$4 sm:$0xff]  }
  0xee   :  { %1803 = vmatpush1.bf16.msra.mxu0 %v3316_v58  ;;  %1886 = vmatprep.subr.bf16.mxu1 %v3327_v61  ;;  %v3483_v58 = vld [vmem:[#allocation7 + $0x74] ss:$8 sps:$4 sm:$0xff]   ;;  %v3481_v61 = vld [vmem:[#allocation7 + $0x70] ss:$8 sps:$4 sm:$0xff]  }
  0xef   :  { %1804 = vmatprep.subr.bf16.mxu0 %v3324_v60  ;;  %v3390_v60 = vld [vmem:[#allocation5 + $0x50c] ss:$16 sps:$4 sm:$0xff]  }
  0xf1   :  { %1887 = vmatpush1.bf16.msra.mxu1 %v3325_v63  ;;  %v3388_v63 = vld [vmem:[#allocation5 + $0x508] ss:$16 sps:$4 sm:$0xff]  }
  0xf2   :  { %1805 = vmatpush1.bf16.msra.mxu0 %v3322_v62  ;;  %1888 = vmatprep.subr.bf16.mxu1 %v3333_v1  ;;  %v3486_v62 = vld [vmem:[#allocation7 + $0x84] ss:$8 sps:$4 sm:$0xff]   ;;  %v3484_v1 = vld [vmem:[#allocation7 + $0x80] ss:$8 sps:$4 sm:$0xff]  }
  0xf3   :  { %1806 = vmatprep.subr.bf16.mxu0 %v3330_v0  ;;  %v3393_v0 = vld [vmem:[#allocation5 + $0x52c] ss:$16 sps:$4 sm:$0xff]  }
  0xf5   :  { %1889 = vmatpush1.bf16.msra.mxu1 %v3331_v3  ;;  %v3391_v3 = vld [vmem:[#allocation5 + $0x528] ss:$16 sps:$4 sm:$0xff]  }
  0xf6   :  { %1807 = vmatpush1.bf16.msra.mxu0 %v3328_v2  ;;  %1890 = vmatprep.subr.bf16.mxu1 %v3339_v5  ;;  %v3489_v2 = vld [vmem:[#allocation7 + $0x94] ss:$8 sps:$4 sm:$0xff]   ;;  %v3487_v5 = vld [vmem:[#allocation7 + $0x90] ss:$8 sps:$4 sm:$0xff]  }
  0xf7   :  { %1808 = vmatprep.subr.bf16.mxu0 %v3336_v4  ;;  %v3396_v4 = vld [vmem:[#allocation5 + $0x54c] ss:$16 sps:$4 sm:$0xff]  }
  0xf9   :  { %1891 = vmatpush1.bf16.msra.mxu1 %v3337_v7  ;;  %v3394_v7 = vld [vmem:[#allocation5 + $0x548] ss:$16 sps:$4 sm:$0xff]  }
  0xfa   :  { %1809 = vmatpush1.bf16.msra.mxu0 %v3334_v6  ;;  %1892 = vmatprep.subr.bf16.mxu1 %v3345_v9  ;;  %v3492_v6 = vld [vmem:[#allocation7 + $0xa4] ss:$8 sps:$4 sm:$0xff]   ;;  %v3490_v9 = vld [vmem:[#allocation7 + $0xa0] ss:$8 sps:$4 sm:$0xff]  }
  0xfb   :  { %1810 = vmatprep.subr.bf16.mxu0 %v3342_v8  ;;  %v3399_v8 = vld [vmem:[#allocation5 + $0x56c] ss:$16 sps:$4 sm:$0xff]  }
  0xfd   :  { %1893 = vmatpush1.bf16.msra.mxu1 %v3343_v11  ;;  %v3397_v11 = vld [vmem:[#allocation5 + $0x568] ss:$16 sps:$4 sm:$0xff]  }
  0xfe   :  { %1811 = vmatpush1.bf16.msra.mxu0 %v3340_v10  ;;  %1894 = vmatprep.subr.bf16.mxu1 %v3351_v14  ;;  %v3495_v10 = vld [vmem:[#allocation7 + $0xb4] ss:$8 sps:$4 sm:$0xff]   ;;  %v3493_v14 = vld [vmem:[#allocation7 + $0xb0] ss:$8 sps:$4 sm:$0xff]  }
  0xff   :  { %1812 = vmatprep.subr.bf16.mxu0 %v3348_v13  ;;  %v3402_v13 = vld [vmem:[#allocation5 + $0x58c] ss:$16 sps:$4 sm:$0xff]  }
 0x101   :  { %1895 = vmatpush1.bf16.msra.mxu1 %v3349_v17  ;;  %v3400_v17 = vld [vmem:[#allocation5 + $0x588] ss:$16 sps:$4 sm:$0xff]  }
 0x102   :  { %1813 = vmatpush1.bf16.msra.mxu0 %v3346_v16  ;;  %1896 = vmatprep.subr.bf16.mxu1 %v3357_v19  ;;  %v3498_v16 = vld [vmem:[#allocation7 + $0xc4] ss:$8 sps:$4 sm:$0xff]   ;;  %v3496_v19 = vld [vmem:[#allocation7 + $0xc0] ss:$8 sps:$4 sm:$0xff]  }
 0x103   :  { %1814 = vmatprep.subr.bf16.mxu0 %v3354_v18  ;;  %v3405_v18 = vld [vmem:[#allocation5 + $0x5ac] ss:$16 sps:$4 sm:$0xff]  }
 0x105   :  { %1897 = vmatpush1.bf16.msra.mxu1 %v3355_v21  ;;  %v3403_v21 = vld [vmem:[#allocation5 + $0x5a8] ss:$16 sps:$4 sm:$0xff]  }
 0x106   :  { %1815 = vmatpush1.bf16.msra.mxu0 %v3352_v20  ;;  %1898 = vmatprep.subr.bf16.mxu1 %v3363_v24  ;;  %v3501_v20 = vld [vmem:[#allocation7 + $0xd4] ss:$8 sps:$4 sm:$0xff]   ;;  %v3499_v24 = vld [vmem:[#allocation7 + $0xd0] ss:$8 sps:$4 sm:$0xff]  }
 0x107   :  { %1816 = vmatprep.subr.bf16.mxu0 %v3360_v23  ;;  %v3408_v23 = vld [vmem:[#allocation5 + $0x5cc] ss:$16 sps:$4 sm:$0xff]  }
 0x109   :  { %1899 = vmatpush1.bf16.msra.mxu1 %v3361_v28  ;;  %v3414_v28 = vld [vmem:[#allocation5 + $0x60c] ss:$16 sps:$4 sm:$0xff]  }
 0x10a   :  { %1817 = vmatpush1.bf16.msra.mxu0 %v3358_v26  ;;  %1909 = vmatprep.subr.bf16.mxu1 %v3366_v29  ;;  %v3411_v26 = vld [vmem:[#allocation5 + $0x5ec] ss:$16 sps:$4 sm:$0xff]   ;;  %v3412_v29 = vld [vmem:[#allocation5 + $0x608] ss:$16 sps:$4 sm:$0xff]  }
 0x10b   :  { %2395 = vmatprep.subr.bf16.mxu0 %v3462_v35  ;;  %v3418_v35 = vld [vmem:[#allocation5 + $0x648] ss:$16 sps:$4 sm:$0xff]  }
 0x10c   :  { %1901 = vmatmul.mubr.bf16.vlgmr.msra.gmra.mrb[4].mxu1 %v3794_v15  ;;  %v3466_v15 = vld [vmem:[#allocation7 + $0x20] ss:$8 sps:$4 sm:$0xff]  }
 0x10d   :  { %1819 = vmatmul.mubr.bf16.vlgmr.msra.gmra.mrb[0].mxu0 %v3809_v31  ;;  %1910 = vmatpush1.bf16.msra.mxu1 %v3364_v30  ;;  %v3417_v30 = vld [vmem:[#allocation5 + $0x62c] ss:$16 sps:$4 sm:$0xff]  }
 0x10e   :  { %1941 = vmatprep.mubr.bf16.mxu1 %v3798_v44  ;;  %1911 = vmatprep.subr.bf16.mxu1 %v3369_v32  ;;  %v3469_v44 = vld [vmem:[#allocation7 + $0x30] ss:$8 sps:$4 sm:$0xff]  }
 0x10f   :  { %2396 = vmatpush1.bf16.msra.mxu0 %v3460_v34  ;;  %v3415_v32 = vld [vmem:[#allocation5 + $0x628] ss:$16 sps:$4 sm:$0xff]   ;;  %v3420_v34 = vld [vmem:[#allocation5 + $0x64c] ss:$16 sps:$4 sm:$0xff]  }
 0x110   :  { %2397 = vmatprep.subr.bf16.mxu0 %v3465_v36  ;;  %v3421_v36 = vld [vmem:[#allocation5 + $0x668] ss:$16 sps:$4 sm:$0xff]  }
 0x111   :  { %1912 = vmatpush1.bf16.msra.mxu1 %v3367_v12  ;;  %v3423_v12 = vld [vmem:[#allocation5 + $0x66c] ss:$16 sps:$4 sm:$0xff]  }
 0x112   :  { %1913 = vmatprep.subr.bf16.mxu1 %v3372_v37  ;;  %v3426_v37 = vld [vmem:[#allocation5 + $0x68c] ss:$16 sps:$4 sm:$0xff]  }
 0x113   :  { %2398 = vmatpush1.bf16.msra.mxu0 %v3463_v38  ;;  %v3424_v38 = vld [vmem:[#allocation5 + $0x688] ss:$16 sps:$4 sm:$0xff]  }
 0x114   :  { %2399 = vmatprep.subr.bf16.mxu0 %v3468_v39  ;;  %v3429_v39 = vld [vmem:[#allocation5 + $0x6ac] ss:$16 sps:$4 sm:$0xff]  }
 0x115   :  { %1914 = vmatpush1.bf16.msra.mxu1 %v3370_v40  ;;  %v3432_v40 = vld [vmem:[#allocation5 + $0x6cc] ss:$16 sps:$4 sm:$0xff]  }
 0x116   :  { %1915 = vmatprep.subr.bf16.mxu1 %v3375_v41  ;;  %v3504_v41 = vld [vmem:[#allocation7 + $0xe4] ss:$8 sps:$4 sm:$0xff]  }
 0x117   :  { %2400 = vmatpush1.bf16.msra.mxu0 %v3466_v15  ;;  %v3502_v15 = vld [vmem:[#allocation7 + $0xe0] ss:$8 sps:$4 sm:$0xff]  }
 0x118   :  { %2401 = vmatprep.subr.bf16.mxu0 %v3471_v43  ;;  %v3430_v43 = vld [vmem:[#allocation5 + $0x6c8] ss:$16 sps:$4 sm:$0xff]  }
 0x119   :  { %1916 = vmatpush1.bf16.msra.mxu1 %v3373_v55 }
 0x11a   :  { %1917 = vmatprep.subr.bf16.mxu1 %v3378_v42 }
 0x11b   :  { %2402 = vmatpush1.bf16.msra.mxu0 %v3469_v44 }
 0x11c   :  { %2403 = vmatprep.subr.bf16.mxu0 %v3474_v45  ;;  %v3435_v45 = vld [vmem:[#allocation5 + $0x6ec] ss:$16 sps:$4 sm:$0xff]  }
 0x11d   :  { %1918 = vmatpush1.bf16.msra.mxu1 %v3376_v46  ;;  %v3507_v46 = vld [vmem:[#allocation7 + $0xf4] ss:$8 sps:$4 sm:$0xff]  }
 0x11e   :  { %1919 = vmatprep.subr.bf16.mxu1 %v3381_v47  ;;  %v3505_v47 = vld [vmem:[#allocation7 + $0xf0] ss:$8 sps:$4 sm:$0xff]  }
 0x11f   :  { %2404 = vmatpush1.bf16.msra.mxu0 %v3472_v48  ;;  %v3433_v48 = vld [vmem:[#allocation5 + $0x6e8] ss:$16 sps:$4 sm:$0xff]  }
 0x120   :  { %2405 = vmatprep.subr.bf16.mxu0 %v3477_v49  ;;  %v3438_v49 = vld [vmem:[#allocation5 + $0x70c] ss:$16 sps:$4 sm:$0xff]  }
 0x121   :  { %1920 = vmatpush1.bf16.msra.mxu1 %v3379_v50  ;;  %v3510_v50 = vld [vmem:[#allocation7 + $0x104] ss:$8 sps:$4 sm:$0xff]  }
 0x122   :  { %1921 = vmatprep.subr.bf16.mxu1 %v3384_v51  ;;  %v3436_v51 = vld [vmem:[#allocation5 + $0x708] ss:$16 sps:$4 sm:$0xff]  }
 0x123   :  { %2406 = vmatpush1.bf16.msra.mxu0 %v3475_v52  ;;  %v3441_v52 = vld [vmem:[#allocation5 + $0x72c] ss:$16 sps:$4 sm:$0xff]  }
 0x124   :  { %2407 = vmatprep.subr.bf16.mxu0 %v3480_v53  ;;  %v3439_v53 = vld [vmem:[#allocation5 + $0x728] ss:$16 sps:$4 sm:$0xff]  }
 0x125   :  { %1922 = vmatpush1.bf16.msra.mxu1 %v3382_v54  ;;  %v3444_v54 = vld [vmem:[#allocation5 + $0x74c] ss:$16 sps:$4 sm:$0xff]  }
 0x126   :  { %1923 = vmatprep.subr.bf16.mxu1 %v3387_v56  ;;  %v3442_v56 = vld [vmem:[#allocation5 + $0x748] ss:$16 sps:$4 sm:$0xff]  }
 0x127   :  { %2408 = vmatpush1.bf16.msra.mxu0 %v3478_v57  ;;  %v3447_v57 = vld [vmem:[#allocation5 + $0x76c] ss:$16 sps:$4 sm:$0xff]  }
 0x128   :  { %2409 = vmatprep.subr.bf16.mxu0 %v3483_v58  ;;  %v3445_v58 = vld [vmem:[#allocation5 + $0x768] ss:$16 sps:$4 sm:$0xff]  }
 0x129   :  { %1924 = vmatpush1.bf16.msra.mxu1 %v3385_v59  ;;  %v3450_v59 = vld [vmem:[#allocation5 + $0x78c] ss:$16 sps:$4 sm:$0xff]  }
 0x12a   :  { %1925 = vmatprep.subr.bf16.mxu1 %v3390_v60  ;;  %v3448_v60 = vld [vmem:[#allocation5 + $0x788] ss:$16 sps:$4 sm:$0xff]  }
 0x12b   :  { %2410 = vmatpush1.bf16.msra.mxu0 %v3481_v61  ;;  %v3453_v61 = vld [vmem:[#allocation5 + $0x7ac] ss:$16 sps:$4 sm:$0xff]  }
 0x12c   :  { %2411 = vmatprep.subr.bf16.mxu0 %v3486_v62  ;;  %v3451_v62 = vld [vmem:[#allocation5 + $0x7a8] ss:$16 sps:$4 sm:$0xff]  }
 0x12d   :  { %1926 = vmatpush1.bf16.msra.mxu1 %v3388_v63  ;;  %v3456_v63 = vld [vmem:[#allocation5 + $0x7cc] ss:$16 sps:$4 sm:$0xff]  }
 0x12e   :  { %1927 = vmatprep.subr.bf16.mxu1 %v3393_v0  ;;  %v3454_v0 = vld [vmem:[#allocation5 + $0x7c8] ss:$16 sps:$4 sm:$0xff]  }
 0x12f   :  { %2412 = vmatpush1.bf16.msra.mxu0 %v3484_v1  ;;  %v3459_v1 = vld [vmem:[#allocation5 + $0x7ec] ss:$16 sps:$4 sm:$0xff]  }
 0x130   :  { %2413 = vmatprep.subr.bf16.mxu0 %v3489_v2  ;;  %v3457_v2 = vld [vmem:[#allocation5 + $0x7e8] ss:$16 sps:$4 sm:$0xff]  }
 0x131   :  { %1928 = vmatpush1.bf16.msra.mxu1 %v3391_v3  ;;  %v363_v3 = vlaneseq }
 0x132   :  { %1929 = vmatprep.subr.bf16.mxu1 %v3396_v4 }
 0x133   :  { %2414 = vmatpush1.bf16.msra.mxu0 %v3487_v5  ;;  %v3817_v4 = vshrl.u32 %v363_v3, 7 }
 0x134   :  { %2415 = vmatprep.subr.bf16.mxu0 %v3492_v6  ;;  %v3823_v6 = vld [vmem:[%s3860_s2] sm:$0xf] }
 0x135   :  { %1930 = vmatpush1.bf16.msra.mxu1 %v3394_v7  ;;  %v365_v5 = vsub.s32 0, %v3817_v4  ;;  %v369_v7 = vsub.s32 1, %v3817_v4 }
 0x136   :  { %1931 = vmatprep.subr.bf16.mxu1 %v3399_v8 }
 0x137   :  { %2416 = vmatpush1.bf16.msra.mxu0 %v3490_v9  ;;  %v366_v8 = vrot.slane %v3823_v6, %v365_v5 }
 0x138   :  { %2417 = vmatprep.subr.bf16.mxu0 %v3495_v10 }
 0x139   :  { %1932 = vmatpush1.bf16.msra.mxu1 %v3397_v11 }
 0x13a   :  { %1933 = vmatprep.subr.bf16.mxu1 %v3402_v13 }
 0x13b   :  { %2418 = vmatpush1.bf16.msra.mxu0 %v3493_v14 }
 0x13c   :  { %2419 = vmatprep.subr.bf16.mxu0 %v3498_v16 }
 0x13d   :  { %1934 = vmatpush1.bf16.msra.mxu1 %v3400_v17 }
 0x13e   :  { %1935 = vmatprep.subr.bf16.mxu1 %v3405_v18 }
 0x13f   :  { %2420 = vmatpush1.bf16.msra.mxu0 %v3496_v19 }
 0x140   :  { %2421 = vmatprep.subr.bf16.mxu0 %v3501_v20 }
 0x141   :  { %1936 = vmatpush1.bf16.msra.mxu1 %v3403_v21 }
 0x142   :  { %1937 = vmatprep.subr.bf16.mxu1 %v3408_v23  ;;  %v3508_v23 = vld [vmem:[#allocation7 + $0x100] ss:$8 sps:$4 sm:$0xff]  }
 0x143   :  { %2422 = vmatpush1.bf16.msra.mxu0 %v3499_v24 }
 0x144   :  { %2423 = vmatprep.subr.bf16.mxu0 %v3504_v41  ;;  %v3520_v41 = vld [vmem:[#allocation7 + $0x140] ss:$8 sps:$4 sm:$0xff]  }
 0x145   :  { %1938 = vmatpush1.bf16.msra.mxu1 %v3406_v25  ;;  %v3513_v25 = vld [vmem:[#allocation7 + $0x114] ss:$8 sps:$4 sm:$0xff]  }
 0x146   :  { %1939 = vmatprep.subr.bf16.mxu1 %v3411_v26  ;;  %v3556_v26 = vld [vmem:[#allocation8 + $0x40] sm:$0xff]  }
 0x147   :  { %2424 = vmatpush1.bf16.msra.mxu0 %v3502_v15  ;;  %v3565_v15 = vld [vmem:[#allocation8 + $0x20] sm:$0xff]  }
 0x148   :  { %2425 = vmatprep.subr.bf16.mxu0 %v3507_v46  ;;  %v3531_v46 = vld [vmem:[#allocation7 + $0x174] ss:$8 sps:$4 sm:$0xff]  }
 0x149   :  { %1940 = vmatpush1.bf16.msra.mxu1 %v3409_v27  ;;  %v3557_v27 = vld [vmem:[#allocation8] sm:$0xff]  }
 0x14a   :  { %1950 = vmatprep.subr.bf16.mxu1 %v3414_v28  ;;  %v3558_v28 = vld [vmem:[#allocation8 + $0x48] sm:$0xff]  }
 0x14b   :  { %2426 = vmatpush1.bf16.msra.mxu0 %v3505_v47  ;;  %v3529_v47 = vld [vmem:[#allocation7 + $0x170] ss:$8 sps:$4 sm:$0xff]  }
 0x14c   :  { %1942 = vmatmul.mubr.bf16.vlgmr.msra.gmra.mrb[4].mxu1 %v3801_v22  ;;  %v3427_v22 = vld [vmem:[#allocation5 + $0x6a8] ss:$16 sps:$4 sm:$0xff]   ;;  %2436 = vmatprep.subr.bf16.mxu0 %v3510_v50  ;;  %v3537_v50 = vld [vmem:[#allocation7 + $0x194] ss:$8 sps:$4 sm:$0xff]  }
 0x14d   :  { %1951 = vmatpush1.bf16.msra.mxu1 %v3412_v29  ;;  %1982 = vmatprep.mubr.bf16.mxu1 %v3805_v33  ;;  %v3511_v29 = vld [vmem:[#allocation7 + $0x110] ss:$8 sps:$4 sm:$0xff]  }
 0x14e   :  { %1952 = vmatprep.subr.bf16.mxu1 %v3417_v30  ;;  %v3516_v30 = vld [vmem:[#allocation7 + $0x124] ss:$8 sps:$4 sm:$0xff]  }
 0x151   :  { %1953 = vmatpush1.bf16.msra.mxu1 %v3415_v32  ;;  %v3559_v32 = vld [vmem:[#allocation8 + $0x8] sm:$0xff]  }
 0x152   :  { %1954 = vmatprep.subr.bf16.mxu1 %v3420_v34  ;;  %v3560_v34 = vld [vmem:[#allocation8 + $0x50] sm:$0xff]  }
 0x155   :  { %1955 = vmatpush1.bf16.msra.mxu1 %v3418_v35  ;;  %v3514_v35 = vld [vmem:[#allocation7 + $0x120] ss:$8 sps:$4 sm:$0xff]  }
 0x156   :  { %1956 = vmatprep.subr.bf16.mxu1 %v3423_v12  ;;  %v3519_v12 = vld [vmem:[#allocation7 + $0x134] ss:$8 sps:$4 sm:$0xff]  }
 0x159   :  { %1957 = vmatpush1.bf16.msra.mxu1 %v3421_v36  ;;  %v3561_v36 = vld [vmem:[#allocation8 + $0x10] sm:$0xff]  }
 0x15a   :  { %1958 = vmatprep.subr.bf16.mxu1 %v3426_v37  ;;  %v3562_v37 = vld [vmem:[#allocation8 + $0x58] sm:$0xff]  }
 0x15d   :  { %1959 = vmatpush1.bf16.msra.mxu1 %v3424_v38  ;;  %v3517_v38 = vld [vmem:[#allocation7 + $0x130] ss:$8 sps:$4 sm:$0xff]  }
 0x15e   :  { %1960 = vmatprep.subr.bf16.mxu1 %v3429_v39  ;;  %v3522_v39 = vld [vmem:[#allocation7 + $0x144] ss:$8 sps:$4 sm:$0xff]  }
 0x15f   :  { %v1697_v33 = vpop.f32.mrb[0].mxu1 }
 0x160   :  { %v1699_v55 = vpop.f32.mrb[1].mxu1  ;;  %v1698_v9 = vadd.f32 %v1697_v33, %v366_v8  ;;  %v3525_v33 = vld [vmem:[#allocation7 + $0x154] ss:$8 sps:$4 sm:$0xff]  }
 0x161   :  { %v1701_v42 = vpop.f32.mrb[2].mxu1  ;;  %1961 = vmatpush1.bf16.msra.mxu1 %v3427_v22  ;;  %v3563_v22 = vld [vmem:[#allocation8 + $0x18] sm:$0xff]  }
 0x162   :  { %v1702_v44 = vpop.f32.mrb[3].mxu1  ;;  %1962 = vmatprep.subr.bf16.mxu1 %v3432_v40  ;;  %v3564_v40 = vld [vmem:[#allocation8 + $0x60] sm:$0xff]   ;;  %v3523_v42 = vld [vmem:[#allocation7 + $0x150] ss:$8 sps:$4 sm:$0xff]  }
 0x163   :  { %v3567_v44 = vld [vmem:[#allocation8 + $0x28] sm:$0xff]  }
 0x165   :  { %1963 = vmatpush1.bf16.msra.mxu1 %v3430_v43  ;;  %v3528_v43 = vld [vmem:[#allocation7 + $0x164] ss:$8 sps:$4 sm:$0xff]  }
 0x166   :  { %1964 = vmatprep.subr.bf16.mxu1 %v3435_v45  ;;  %v3526_v45 = vld [vmem:[#allocation7 + $0x160] ss:$8 sps:$4 sm:$0xff]  }
 0x169   :  { %1965 = vmatpush1.bf16.msra.mxu1 %v3433_v48  ;;  %v3534_v48 = vld [vmem:[#allocation7 + $0x184] ss:$8 sps:$4 sm:$0xff]  }
 0x16a   :  { %1966 = vmatprep.subr.bf16.mxu1 %v3438_v49  ;;  %v3532_v49 = vld [vmem:[#allocation7 + $0x180] ss:$8 sps:$4 sm:$0xff]  }
 0x16d   :  { %1967 = vmatpush1.bf16.msra.mxu1 %v3436_v51  ;;  %v3535_v51 = vld [vmem:[#allocation7 + $0x190] ss:$8 sps:$4 sm:$0xff]  }
 0x16e   :  { %1968 = vmatprep.subr.bf16.mxu1 %v3441_v52  ;;  %v3540_v52 = vld [vmem:[#allocation7 + $0x1a4] ss:$8 sps:$4 sm:$0xff]  }
 0x171   :  { %1969 = vmatpush1.bf16.msra.mxu1 %v3439_v53  ;;  %v3538_v53 = vld [vmem:[#allocation7 + $0x1a0] ss:$8 sps:$4 sm:$0xff]  }
 0x172   :  { %1970 = vmatprep.subr.bf16.mxu1 %v3444_v54  ;;  %v3543_v54 = vld [vmem:[#allocation7 + $0x1b4] ss:$8 sps:$4 sm:$0xff]  }
 0x175   :  { %1971 = vmatpush1.bf16.msra.mxu1 %v3442_v56  ;;  %v3541_v56 = vld [vmem:[#allocation7 + $0x1b0] ss:$8 sps:$4 sm:$0xff]  }
 0x176   :  { %1972 = vmatprep.subr.bf16.mxu1 %v3447_v57  ;;  %v3546_v57 = vld [vmem:[#allocation7 + $0x1c4] ss:$8 sps:$4 sm:$0xff]  }
 0x179   :  { %1973 = vmatpush1.bf16.msra.mxu1 %v3445_v58  ;;  %v3544_v58 = vld [vmem:[#allocation7 + $0x1c0] ss:$8 sps:$4 sm:$0xff]  }
 0x17a   :  { %1974 = vmatprep.subr.bf16.mxu1 %v3450_v59  ;;  %v3549_v59 = vld [vmem:[#allocation7 + $0x1d4] ss:$8 sps:$4 sm:$0xff]  }
 0x17d   :  { %1975 = vmatpush1.bf16.msra.mxu1 %v3448_v60  ;;  %v3547_v60 = vld [vmem:[#allocation7 + $0x1d0] ss:$8 sps:$4 sm:$0xff]  }
 0x17e   :  { %1976 = vmatprep.subr.bf16.mxu1 %v3453_v61  ;;  %v3552_v61 = vld [vmem:[#allocation7 + $0x1e4] ss:$8 sps:$4 sm:$0xff]  }
 0x181   :  { %1977 = vmatpush1.bf16.msra.mxu1 %v3451_v62  ;;  %v3550_v62 = vld [vmem:[#allocation7 + $0x1e0] ss:$8 sps:$4 sm:$0xff]  }
 0x182   :  { %1978 = vmatprep.subr.bf16.mxu1 %v3456_v63  ;;  %v3555_v63 = vld [vmem:[#allocation7 + $0x1f4] ss:$8 sps:$4 sm:$0xff]  }
 0x185   :  { %1979 = vmatpush1.bf16.msra.mxu1 %v3454_v0  ;;  %v3553_v0 = vld [vmem:[#allocation7 + $0x1f0] ss:$8 sps:$4 sm:$0xff]  }
 0x186   :  { %1980 = vmatprep.subr.bf16.mxu1 %v3459_v1  ;;  %v373_v1 = vsub.s32 2, %v3817_v4 }
 0x188   :  { %v374_v3 = vrot.slane %v3823_v6, %v373_v1 }
 0x189   :  { %1981 = vmatpush1.bf16.msra.mxu1 %v3457_v2  ;;  %v377_v2 = vsub.s32 3, %v3817_v4 }
 0x18a   :  { %3011 = vmatprep.subr.bf16.mxu1 %v3556_v26 }
 0x18b   :  { %v378_v8 = vrot.slane %v3823_v6, %v377_v2 }
 0x18c   :  { %1983 = vmatmul.mubr.bf16.vlgmr.msra.gmra.mrb[4].mxu1 %v3809_v31  ;;  %v370_v31 = vrot.slane %v3823_v6, %v369_v7  ;;  %v2063_v6 = vld [vmem:[%s3862_s4] sm:$0x3] }
 0x18d   :  { %3012 = vmatpush3.bf16.msra.mxu1 %v3557_v27  ;;  %v2072_v26 = vrot.slane %v2063_v6, %v369_v7 }
 0x18e   :  { %v1700_v10 = vadd.f32 %v1699_v55, %v370_v31  ;;  %3013 = vmatprep.subr.bf16.mxu1 %v3558_v28  ;;  %v3566_v55 = vld [vmem:[#allocation8 + $0x68] sm:$0xff]  }
 0x191   :  { %3014 = vmatpush3.bf16.msra.mxu1 %v3559_v32 }
 0x192   :  { %3015 = vmatprep.subr.bf16.mxu1 %v3560_v34 }
 0x195   :  { %3016 = vmatpush3.bf16.msra.mxu1 %v3561_v36 }
 0x196   :  { %3017 = vmatprep.subr.bf16.mxu1 %v3562_v37 }
 0x199   :  { %3018 = vmatpush3.bf16.msra.mxu1 %v3563_v22 }
 0x19a   :  { %3019 = vmatprep.subr.bf16.mxu1 %v3564_v40 }
 0x19d   :  { %3020 = vmatpush3.bf16.msra.mxu1 %v3565_v15 }
 0x19e   :  { %3021 = vmatprep.subr.bf16.mxu1 %v3566_v55 }
 0x1a1   :  { %3022 = vmatpush3.bf16.msra.mxu1 %v3567_v44 }
 0x1e0   :  { %v1820_v11 = vpop.f32.mrb[0].mxu0 }
 0x1e1   :  { %v3034_v13 = vadd.f32 %v1820_v11, %v1698_v9  ;;  %v1822_v14 = vpop.f32.mrb[1].mxu0 }
 0x1e2   :  { %v3036_v16 = vadd.f32 %v1822_v14, %v1700_v10  ;;  %v1824_v17 = vpop.f32.mrb[2].mxu0 }
 0x1e3   :  { %v1991_v18 = vmax.f32 %v3034_v13, 0.0  ;;  %v1825_v19 = vpop.f32.mrb[3].mxu0 }
 0x1e4   :  { %v1992_v20 = vmax.f32 %v3036_v16, 0.0 }
 0x1e5   :  { %v1995_v24 = vpack.c.bf16 %v1991_v18, %v1991_v18 }
 0x1e6   :  { %v1996_v21 = vpack.c.bf16 %v1992_v20, %v1992_v20  ;;  %v3568_v20 = vld [vmem:[#allocation8 + $0x70] sm:$0xff]  }
 0x1e7   :  { %3023 = vmatprep.subr.bf16.mxu1 %v3568_v20 }
 0x1e8   :  { %2427 = vmatprep.mubr.bf16.mxu0 %v1996_v21  ;;  %v3569_v21 = vld [vmem:[#allocation8 + $0x30] sm:$0xff]  }
 0x1e9   :  { %2428 = vmatmul.mubr.bf16.vlgmr.msra.gmra.mrb[4].mxu0 %v1995_v24  ;;  %3024 = vmatpush3.bf16.msra.mxu1 %v3569_v21  ;;  %v3571_v24 = vld [vmem:[#allocation8 + $0x38] sm:$0xff]  }
 0x1ea   :  { %2437 = vmatpush1.bf16.msra.mxu0 %v3508_v23  ;;  %v3570_v23 = vld [vmem:[#allocation8 + $0x78] sm:$0xff]  }
 0x1eb   :  { %2438 = vmatprep.subr.bf16.mxu0 %v3513_v25  ;;  %3025 = vmatprep.subr.bf16.mxu1 %v3570_v23  ;;  %v2068_v25 = vrot.slane %v2063_v6, %v365_v5  ;;  %v2994_v5 = vld [vmem:[%s3864_s6] ss:$0 sm:$0xff] }
 0x1ed   :  { %3026 = vmatpush3.bf16.msra.mxu1 %v3571_v24 }
 0x1ee   :  { %2439 = vmatpush1.bf16.msra.mxu0 %v3511_v29 }
 0x1ef   :  { %2440 = vmatprep.subr.bf16.mxu0 %v3516_v30 }
 0x1f2   :  { %2441 = vmatpush1.bf16.msra.mxu0 %v3514_v35 }
 0x1f3   :  { %2442 = vmatprep.subr.bf16.mxu0 %v3519_v12 }
 0x1f6   :  { %2443 = vmatpush1.bf16.msra.mxu0 %v3517_v38 }
 0x1f7   :  { %2444 = vmatprep.subr.bf16.mxu0 %v3522_v39 }
 0x1fa   :  { %2445 = vmatpush1.bf16.msra.mxu0 %v3520_v41 }
 0x1fb   :  { %2446 = vmatprep.subr.bf16.mxu0 %v3525_v33 }
 0x1fe   :  { %2447 = vmatpush1.bf16.msra.mxu0 %v3523_v42 }
 0x1ff   :  { %2448 = vmatprep.subr.bf16.mxu0 %v3528_v43 }
 0x202   :  { %2449 = vmatpush1.bf16.msra.mxu0 %v3526_v45 }
 0x203   :  { %2450 = vmatprep.subr.bf16.mxu0 %v3531_v46 }
 0x206   :  { %2451 = vmatpush1.bf16.msra.mxu0 %v3529_v47 }
 0x207   :  { %2452 = vmatprep.subr.bf16.mxu0 %v3534_v48 }
 0x20a   :  { %2453 = vmatpush1.bf16.msra.mxu0 %v3532_v49 }
 0x20b   :  { %2454 = vmatprep.subr.bf16.mxu0 %v3537_v50 }
 0x20e   :  { %2455 = vmatpush1.bf16.msra.mxu0 %v3535_v51 }
 0x20f   :  { %2456 = vmatprep.subr.bf16.mxu0 %v3540_v52 }
 0x212   :  { %2457 = vmatpush1.bf16.msra.mxu0 %v3538_v53 }
 0x213   :  { %2458 = vmatprep.subr.bf16.mxu0 %v3543_v54 }
 0x216   :  { %2459 = vmatpush1.bf16.msra.mxu0 %v3541_v56 }
 0x217   :  { %2460 = vmatprep.subr.bf16.mxu0 %v3546_v57 }
 0x21a   :  { %2461 = vmatpush1.bf16.msra.mxu0 %v3544_v58 }
 0x21b   :  { %2462 = vmatprep.subr.bf16.mxu0 %v3549_v59 }
 0x21e   :  { %2463 = vmatpush1.bf16.msra.mxu0 %v3547_v60 }
 0x21f   :  { %2464 = vmatprep.subr.bf16.mxu0 %v3552_v61 }
 0x222   :  { %2465 = vmatpush1.bf16.msra.mxu0 %v3550_v62 }
 0x223   :  { %2466 = vmatprep.subr.bf16.mxu0 %v3555_v63 }
 0x226   :  { %2467 = vmatpush1.bf16.msra.mxu0 %v3553_v0 }
 0x25f   :  { %v1984_v31 = vpop.f32.mrb[4].mxu1 }
 0x260   :  { %v3037_v9 = vadd.f32 %v1984_v31, %v374_v3  ;;  %v1986_v10 = vpop.f32.mrb[5].mxu1 }
 0x261   :  { %v3038_v11 = vadd.f32 %v1986_v10, %v378_v8  ;;  %v1988_v13 = vpop.f32.mrb[6].mxu1 }
 0x262   :  { %v1993_v14 = vmax.f32 %v3037_v9, 0.0  ;;  %v1989_v16 = vpop.f32.mrb[7].mxu1 }
 0x263   :  { %v1994_v17 = vmax.f32 %v3038_v11, 0.0 }
 0x264   :  { %v1997_v19 = vpack.c.bf16 %v1993_v14, %v1993_v14 }
 0x265   :  { %v1998_v18 = vpack.c.bf16 %v1994_v17, %v1994_v17 }
 0x267   :  { %2468 = vmatprep.mubr.bf16.mxu0 %v1998_v18 }
 0x268   :  { %2469 = vmatmul.mubr.bf16.vlgmr.msra.gmra.mrb[4].mxu0 %v1997_v19 }
 0x33b   :  { %v2470_v27 = vpop.f32.mrb[4].mxu0 }
 0x33c   :  { %v3039_v28 = vadd.f32 %v2470_v27, %v2068_v25  ;;  %v2472_v29 = vpop.f32.mrb[5].mxu0 }
 0x33d   :  { %v3040_v30 = vadd.f32 %v2472_v29, %v2072_v26  ;;  %v2474_v32 = vpop.f32.mrb[6].mxu0 }
 0x33e   :  { %v2477_v34 = vmax.f32 %v3039_v28, 0.0  ;;  %v2475_v35 = vpop.f32.mrb[7].mxu0 }
 0x33f   :  { %v2478_v12 = vmax.f32 %v3040_v30, 0.0 }
 0x340   :  { %v2479_v37 = vpack.c.bf16 %v2477_v34, %v2477_v34 }
 0x341   :  { %v2480_v36 = vpack.c.bf16 %v2478_v12, %v2478_v12 }
 0x343   :  { %2648 = vmatprep.mubr.bf16.mxu1 %v2480_v36 }
 0x344   :  { %2649 = vmatmul.mubr.bf16.vlgmr.msra.gmra.mrb[8].mxu1 %v2479_v37 }
 0x417   :  { %v3027_v38 = vpop.f32.mrb[8].mxu1 }
 0x418   :  { %v3028_v39 = vpop.f32.mrb[9].mxu1 }
 0x419   :  { %v3029_v4 = vadd.f32 %v3028_v39, %v3027_v38  ;;  %v3030_v7 = vpop.f32.mrb[10].mxu1 }
 0x41a   :  { %v3031_v22 = vpop.f32.mrb[11].mxu1 }
 0x41b   :  { %v2651_v40 = vadd.f32 %v3029_v4, %v2994_v5 }
 0x41d   :  { %2656 = vst [vmem:[#allocation10] sm:$0xff] %v2651_v40 }
 0x41e   :  { %3671 = shalt.err (!%p3668_p8)
}
 0x41f   :  { %s3672_s6 = scalar_lea.hbm %s3865_s7, 128 }
 0x420   :  { %p3673_p9 = scmp.ne.s32.totalorder %s3865_s7, %s3672_s6  ;;  %p3676_p10 = scmp.lt.u32.totalorder %s3672_s6, %s3865_s7 }
 0x422   :  { %p3678_p11 = pnand %p3676_p10, %p3673_p9 }
 0x424   :  { %3681 = shalt.err (!%p3678_p11)
}
 0x425   :  { %2666 = dma.vmem_to_hbm [thread:$0]  %s2664_s9, 128, %s3865_s7, [#allocation4]  }
 0x426   :  { %3688 = dma.done.wait [#allocation4], 128  }
 0x427   :  { %3689 = vsyncadd [#allocation4], 4294967168 }
 0x428   :  { %2670 = vsyncpa [#allocation3], 1 }
 0x429   :  { %2671 = vsyncpa [#allocation6], 1 }
 0x42a   :  { %2672 = vsyncpa [#allocation9], 1 }
 0x42b   :  { %2673 = vsyncpa [#allocation4], 1 }

</bundles_post_ra>
